<compile_context>
chip_gen: v7x
topology: tpu7x:2x2x1
jax: 0.10.0
libtpu: 0.0.40
codegen_flags: <defaults>
</compile_context>

<pallas_src>
import jax
import jax.numpy as jnp
from jax.experimental import pallas as pl
from jax.experimental.pallas import tpu as pltpu


def _make_kernel(n_layers, B, N, F):
    """Build the fused kernel for a fixed (static) layer count / shape."""

    def kernel(*refs):
        idx = 0
        x_ref = refs[idx]; idx += 1
        w_hbm = refs[idx:idx + n_layers]; idx += n_layers        # HBM (pl.ANY)
        b_refs = refs[idx:idx + n_layers]; idx += n_layers       # VMEM, f32 [1, out]
        lam_ref = refs[idx]; idx += 1                            # VMEM, f32 [F, F]
        out_ref = refs[idx]; idx += 1                            # VMEM, f32 [B, N, N]
        w_vmem = refs[idx:idx + n_layers]; idx += n_layers       # bf16 scratch per layer
        sem = refs[idx]; idx += 1                                # DMA sems (n_layers,)
        h3_ref = refs[idx]; idx += 1                             # f32 [B*N, F] scratch
        hl_ref = refs[idx]                                       # f32 [B*N, F] scratch

        f32 = jnp.float32

        # ---- Issue ALL weight DMAs up front so HBM->VMEM transfer overlaps
        # with the MLP GEMMs; layer i only waits on its own copy.
        copies = []
        for i in range(n_layers):
            cp = pltpu.make_async_copy(w_hbm[i], w_vmem[i], sem.at[i])
            cp.start()
            copies.append(cp)

        # ---- MLP: h = ReLU(h @ W_i + b_i) for every layer (activation after
        # the last layer too, matching the module's always-true guard).
        h = x_ref[...]                                           # [B, N*D] f32
        for i in range(n_layers):
            copies[i].wait()
            W = w_vmem[i][...]                                   # bf16 [in, out] (pre-transposed)
            b = b_refs[i][...]                                   # f32  [1, out]
            h = jnp.dot(h.astype(W.dtype), W, preferred_element_type=f32) + b
            h = jnp.maximum(h, 0.0)

        # ---- Relayout [B, N*F] -> rows of F, n-major (row = n*B + b):
        # N stores of a [B, F] lane-window (half the store count of a
        # per-(b, n) loop).  Scratch is fully overwritten before being read.
        for n in range(N):
            h3_ref[n * B:(n + 1) * B, :] = h[:, n * F:(n + 1) * F]

        # ---- Hoisted lamda matmul: one [B*N, F] @ [F, F] MXU pass.
        lam = lam_ref[...]                                       # [F, F] f32
        hl_ref[...] = jnp.dot(h3_ref[...], lam, preferred_element_type=f32)

        # ---- Per-batch bilinear form: strided row reads undo the n-major
        # interleave (rows b, b+B, ..., b+(N-1)*B) -> [N, F]; trans_b matmul
        # on the MXU (no explicit XLU transpose).
        outs = []
        for bi in range(B):
            hb = h3_ref[pl.ds(bi, N, stride=B), :]               # [N, F]
            hl = hl_ref[pl.ds(bi, N, stride=B), :]               # [N, F]
            outs.append(jax.lax.dot_general(
                hl, hb, (((1,), (1,)), ((), ())), preferred_element_type=f32))
        out_ref[...] = jnp.stack(outs, axis=0)                   # single [B, N, N] store

    return kernel


def fc_innerdot_forward(x, weights, biases, lam):
    """x: [B, N, D] f32; weights[i]: [dims[i], dims[i+1]] bf16 (pre-transposed);
    biases[i]: [1, dims[i+1]] f32; lam: [F, F] f32.  Returns [B, N, N] f32."""
    B, N, D = x.shape
    F = lam.shape[0]
    n_layers = len(weights)
    out_dim = weights[-1].shape[1]
    assert out_dim == N * F, "final Linear width must equal N * laten_size"

    x_flat = x.reshape(B, N * D).astype(jnp.float32)     # torch: reshape(B, -1)
    inputs = [x_flat] + list(weights) + list(biases) + [lam]

    vmem = pl.BlockSpec(memory_space=pltpu.MemorySpace.VMEM)
    hbm = pl.BlockSpec(memory_space=pl.ANY)               # weights DMA'd manually
    in_specs = [vmem] + [hbm] * n_layers + [vmem] * n_layers + [vmem]

    scratch_shapes = (
        [pltpu.VMEM(w.shape, w.dtype) for w in weights]   # per-layer weight buffers
        + [pltpu.SemaphoreType.DMA((n_layers,))]          # one DMA sem per layer
        + [pltpu.VMEM((B * N, F), jnp.float32),           # h3 rows (n-major)
           pltpu.VMEM((B * N, F), jnp.float32)]           # h3 @ lamda rows
    )

    return pl.pallas_call(
        _make_kernel(n_layers, B, N, F),
        out_shape=jax.ShapeDtypeStruct((B, N, N), jnp.float32),
        in_specs=in_specs,
        out_specs=vmem,
        scratch_shapes=scratch_shapes,
        compiler_params=pltpu.CompilerParams(vmem_limit_bytes=32 * 1024 * 1024),
    )(*inputs)


def make_params(key, dims, latent):
    """Deterministic synthetic parameters. Weights stored pre-transposed [in, out]."""
    n = len(dims) - 1
    keys = jax.random.split(key, 2 * n + 1)
    weights, biases = [], []
    for i in range(n):
        fan_in, fan_out = dims[i], dims[i + 1]
        limit = (6.0 / (fan_in + fan_out)) ** 0.5                 # xavier-uniform-like
        W = jax.random.uniform(keys[2 * i], (fan_in, fan_out), jnp.float32, -limit, limit)
        b_lim = 1.0 / (fan_in ** 0.5)
        b = jax.random.uniform(keys[2 * i + 1], (1, fan_out), jnp.float32, -b_lim, b_lim)
        weights.append(W.astype(jnp.bfloat16))   # bf16 MXU operands, f32 accumulation
        biases.append(b)
    lim = (6.0 / (2 * latent)) ** 0.5
    lam = jax.random.uniform(keys[-1], (latent, latent), jnp.float32, -lim, lim)
    return weights, biases, lam


def reference_forward(x, weights, biases, lam):
    """Plain-JAX mirror of the kernel math (same bf16 operand casts)."""
    B, N, D = x.shape
    h = x.reshape(B, N * D).astype(jnp.float32)
    for W, b in zip(weights, biases):
        h = jnp.maximum(
            jnp.dot(h.astype(W.dtype), W, preferred_element_type=jnp.float32) + b, 0.0)
    F = lam.shape[0]
    h3 = h.reshape(B, N, F)
    hl = jnp.einsum("bnf,fg->bng", h3, lam, preferred_element_type=jnp.float32)
    return jnp.einsum("bnf,bmf->bnm", hl, h3, preferred_element_type=jnp.float32)


if __name__ == "__main__":
    key = jax.random.PRNGKey(0)
    k_x, k_p = jax.random.split(key)

    # Small shapes consistent with the module: in_tensor [B, N, D], flattened
    # MLP input = N*D, final Linear width = N * laten_size so the (B, N, -1)
    # reshape yields the laten_size feature dim consumed by `lamda`.
    B, N, D = 2, 8, 16
    LATENT = 32                      # laten_size
    HIDDEN = [256, 1024, 256]        # module default `layer`
    IN_DIM = N * D                   # 128
    OUT_DIM = N * LATENT             # 256
    dims = [IN_DIM] + HIDDEN + [OUT_DIM]

    x = jax.random.normal(k_x, (B, N, D), jnp.float32)
    weights, biases, lam = make_params(k_p, dims, LATENT)

    out = fc_innerdot_forward(x, weights, biases, lam)
    jax.block_until_ready(out)

    ref = reference_forward(x, weights, biases, lam)
    assert out.shape == (B, N, N)
    assert bool(jnp.all(jnp.isfinite(out)))
    rel_err = float(jnp.max(jnp.abs(out - ref)) / (jnp.max(jnp.abs(ref)) + 1e-6))
    assert rel_err < 1e-2, f"kernel mismatch vs reference: rel err {rel_err}"
    print("KERNEL_OK")
</pallas_src>

<mosaic_0001>
module attributes {stable_mosaic.version = 11 : i64} {
  func.func @kernel(%arg0: memref<2x128xf32, #tpu.memory_space<vmem>>, %arg1: memref<128x256xbf16, #tpu.memory_space<any>>, %arg2: memref<256x1024xbf16, #tpu.memory_space<any>>, %arg3: memref<1024x256xbf16, #tpu.memory_space<any>>, %arg4: memref<256x256xbf16, #tpu.memory_space<any>>, %arg5: memref<1x256xf32, #tpu.memory_space<vmem>>, %arg6: memref<1x1024xf32, #tpu.memory_space<vmem>>, %arg7: memref<1x256xf32, #tpu.memory_space<vmem>>, %arg8: memref<1x256xf32, #tpu.memory_space<vmem>>, %arg9: memref<32x32xf32, #tpu.memory_space<vmem>>, %arg10: memref<2x8x8xf32, #tpu.memory_space<vmem>>, %arg11: memref<128x256xbf16, #tpu.memory_space<vmem>>, %arg12: memref<256x1024xbf16, #tpu.memory_space<vmem>>, %arg13: memref<1024x256xbf16, #tpu.memory_space<vmem>>, %arg14: memref<256x256xbf16, #tpu.memory_space<vmem>>, %arg15: memref<4x!tpu.dma_semaphore, #tpu.memory_space<semaphore_mem>>, %arg16: memref<16x32xf32, #tpu.memory_space<vmem>>, %arg17: memref<16x32xf32, #tpu.memory_space<vmem>>) attributes {dimension_semantics = [], scalar_prefetch = 0 : i64, scratch_operands = 7 : i64, tpu.core_type = #tpu.core_type<tc>} {
    %c0_i32 = arith.constant 0 : i32
    %0 = tpu.memref_slice %arg15[%c0_i32] : memref<4x!tpu.dma_semaphore, #tpu.memory_space<semaphore_mem>> -> memref<1x!tpu.dma_semaphore, #tpu.memory_space<semaphore_mem>>
    %1 = tpu.memref_squeeze %0 : memref<1x!tpu.dma_semaphore, #tpu.memory_space<semaphore_mem>> -> memref<!tpu.dma_semaphore, #tpu.memory_space<semaphore_mem>>
    tpu.enqueue_dma source(%arg1 : memref<128x256xbf16, #tpu.memory_space<any>>) target(%arg11 : memref<128x256xbf16, #tpu.memory_space<vmem>>) target_semaphore(%1 : memref<!tpu.dma_semaphore, #tpu.memory_space<semaphore_mem>>)
    %c1_i32 = arith.constant 1 : i32
    %2 = tpu.memref_slice %arg15[%c1_i32] : memref<4x!tpu.dma_semaphore, #tpu.memory_space<semaphore_mem>> -> memref<1x!tpu.dma_semaphore, #tpu.memory_space<semaphore_mem>>
    %3 = tpu.memref_squeeze %2 : memref<1x!tpu.dma_semaphore, #tpu.memory_space<semaphore_mem>> -> memref<!tpu.dma_semaphore, #tpu.memory_space<semaphore_mem>>
    tpu.enqueue_dma source(%arg2 : memref<256x1024xbf16, #tpu.memory_space<any>>) target(%arg12 : memref<256x1024xbf16, #tpu.memory_space<vmem>>) target_semaphore(%3 : memref<!tpu.dma_semaphore, #tpu.memory_space<semaphore_mem>>)
    %c2_i32 = arith.constant 2 : i32
    %4 = tpu.memref_slice %arg15[%c2_i32] : memref<4x!tpu.dma_semaphore, #tpu.memory_space<semaphore_mem>> -> memref<1x!tpu.dma_semaphore, #tpu.memory_space<semaphore_mem>>
    %5 = tpu.memref_squeeze %4 : memref<1x!tpu.dma_semaphore, #tpu.memory_space<semaphore_mem>> -> memref<!tpu.dma_semaphore, #tpu.memory_space<semaphore_mem>>
    tpu.enqueue_dma source(%arg3 : memref<1024x256xbf16, #tpu.memory_space<any>>) target(%arg13 : memref<1024x256xbf16, #tpu.memory_space<vmem>>) target_semaphore(%5 : memref<!tpu.dma_semaphore, #tpu.memory_space<semaphore_mem>>)
    %c3_i32 = arith.constant 3 : i32
    %6 = tpu.memref_slice %arg15[%c3_i32] : memref<4x!tpu.dma_semaphore, #tpu.memory_space<semaphore_mem>> -> memref<1x!tpu.dma_semaphore, #tpu.memory_space<semaphore_mem>>
    %7 = tpu.memref_squeeze %6 : memref<1x!tpu.dma_semaphore, #tpu.memory_space<semaphore_mem>> -> memref<!tpu.dma_semaphore, #tpu.memory_space<semaphore_mem>>
    tpu.enqueue_dma source(%arg4 : memref<256x256xbf16, #tpu.memory_space<any>>) target(%arg14 : memref<256x256xbf16, #tpu.memory_space<vmem>>) target_semaphore(%7 : memref<!tpu.dma_semaphore, #tpu.memory_space<semaphore_mem>>)
    %c0 = arith.constant 0 : index
    %c0_0 = arith.constant 0 : index
    %8 = vector.load %arg0[%c0, %c0_0] : memref<2x128xf32, #tpu.memory_space<vmem>>, vector<2x128xf32>
    %c0_i32_1 = arith.constant 0 : i32
    %9 = tpu.memref_slice %arg15[%c0_i32_1] : memref<4x!tpu.dma_semaphore, #tpu.memory_space<semaphore_mem>> -> memref<1x!tpu.dma_semaphore, #tpu.memory_space<semaphore_mem>>
    %10 = tpu.memref_squeeze %9 : memref<1x!tpu.dma_semaphore, #tpu.memory_space<semaphore_mem>> -> memref<!tpu.dma_semaphore, #tpu.memory_space<semaphore_mem>>
    tpu.wait_dma2 semaphore(%10 : memref<!tpu.dma_semaphore, #tpu.memory_space<semaphore_mem>>) src(%arg1 : memref<128x256xbf16, #tpu.memory_space<any>>) dst(%arg11 : memref<128x256xbf16, #tpu.memory_space<vmem>>)
    %c0_2 = arith.constant 0 : index
    %c0_3 = arith.constant 0 : index
    %11 = vector.load %arg11[%c0_2, %c0_3] : memref<128x256xbf16, #tpu.memory_space<vmem>>, vector<128x256xbf16>
    %c0_4 = arith.constant 0 : index
    %c0_5 = arith.constant 0 : index
    %12 = vector.load %arg5[%c0_4, %c0_5] : memref<1x256xf32, #tpu.memory_space<vmem>>, vector<1x256xf32>
    %13 = arith.truncf %8 : vector<2x128xf32> to vector<2x128xbf16>
    %cst = arith.constant dense<0.000000e+00> : vector<2x256xf32>
    %14 = tpu.matmul %13, %11, %cst {dimension_numbers = #tpu.dot_dimension_numbers<[1], [0], [0], [1], [0, 0, 1, 1], [], []>} : vector<2x128xbf16>, vector<128x256xbf16>, vector<2x256xf32> -> vector<2x256xf32>
    %15 = vector.broadcast %12 : vector<1x256xf32> to vector<2x256xf32>
    %16 = arith.addf %14, %15 : vector<2x256xf32>
    %cst_6 = arith.constant 0.000000e+00 : f32
    %17 = vector.broadcast %cst_6 : f32 to vector<2x256xf32>
    %18 = arith.maximumf %16, %17 : vector<2x256xf32>
    %c1_i32_7 = arith.constant 1 : i32
    %19 = tpu.memref_slice %arg15[%c1_i32_7] : memref<4x!tpu.dma_semaphore, #tpu.memory_space<semaphore_mem>> -> memref<1x!tpu.dma_semaphore, #tpu.memory_space<semaphore_mem>>
    %20 = tpu.memref_squeeze %19 : memref<1x!tpu.dma_semaphore, #tpu.memory_space<semaphore_mem>> -> memref<!tpu.dma_semaphore, #tpu.memory_space<semaphore_mem>>
    tpu.wait_dma2 semaphore(%20 : memref<!tpu.dma_semaphore, #tpu.memory_space<semaphore_mem>>) src(%arg2 : memref<256x1024xbf16, #tpu.memory_space<any>>) dst(%arg12 : memref<256x1024xbf16, #tpu.memory_space<vmem>>)
    %c0_8 = arith.constant 0 : index
    %c0_9 = arith.constant 0 : index
    %21 = vector.load %arg12[%c0_8, %c0_9] : memref<256x1024xbf16, #tpu.memory_space<vmem>>, vector<256x1024xbf16>
    %c0_10 = arith.constant 0 : index
    %c0_11 = arith.constant 0 : index
    %22 = vector.load %arg6[%c0_10, %c0_11] : memref<1x1024xf32, #tpu.memory_space<vmem>>, vector<1x1024xf32>
    %23 = arith.truncf %18 : vector<2x256xf32> to vector<2x256xbf16>
    %cst_12 = arith.constant dense<0.000000e+00> : vector<2x1024xf32>
    %24 = tpu.matmul %23, %21, %cst_12 {dimension_numbers = #tpu.dot_dimension_numbers<[1], [0], [0], [1], [0, 0, 1, 1], [], []>} : vector<2x256xbf16>, vector<256x1024xbf16>, vector<2x1024xf32> -> vector<2x1024xf32>
    %25 = vector.broadcast %22 : vector<1x1024xf32> to vector<2x1024xf32>
    %26 = arith.addf %24, %25 : vector<2x1024xf32>
    %cst_13 = arith.constant 0.000000e+00 : f32
    %27 = vector.broadcast %cst_13 : f32 to vector<2x1024xf32>
    %28 = arith.maximumf %26, %27 : vector<2x1024xf32>
    %c2_i32_14 = arith.constant 2 : i32
    %29 = tpu.memref_slice %arg15[%c2_i32_14] : memref<4x!tpu.dma_semaphore, #tpu.memory_space<semaphore_mem>> -> memref<1x!tpu.dma_semaphore, #tpu.memory_space<semaphore_mem>>
    %30 = tpu.memref_squeeze %29 : memref<1x!tpu.dma_semaphore, #tpu.memory_space<semaphore_mem>> -> memref<!tpu.dma_semaphore, #tpu.memory_space<semaphore_mem>>
    tpu.wait_dma2 semaphore(%30 : memref<!tpu.dma_semaphore, #tpu.memory_space<semaphore_mem>>) src(%arg3 : memref<1024x256xbf16, #tpu.memory_space<any>>) dst(%arg13 : memref<1024x256xbf16, #tpu.memory_space<vmem>>)
    %c0_15 = arith.constant 0 : index
    %c0_16 = arith.constant 0 : index
    %31 = vector.load %arg13[%c0_15, %c0_16] : memref<1024x256xbf16, #tpu.memory_space<vmem>>, vector<1024x256xbf16>
    %c0_17 = arith.constant 0 : index
    %c0_18 = arith.constant 0 : index
    %32 = vector.load %arg7[%c0_17, %c0_18] : memref<1x256xf32, #tpu.memory_space<vmem>>, vector<1x256xf32>
    %33 = arith.truncf %28 : vector<2x1024xf32> to vector<2x1024xbf16>
    %cst_19 = arith.constant dense<0.000000e+00> : vector<2x256xf32>
    %34 = tpu.matmul %33, %31, %cst_19 {dimension_numbers = #tpu.dot_dimension_numbers<[1], [0], [0], [1], [0, 0, 1, 1], [], []>} : vector<2x1024xbf16>, vector<1024x256xbf16>, vector<2x256xf32> -> vector<2x256xf32>
    %35 = vector.broadcast %32 : vector<1x256xf32> to vector<2x256xf32>
    %36 = arith.addf %34, %35 : vector<2x256xf32>
    %cst_20 = arith.constant 0.000000e+00 : f32
    %37 = vector.broadcast %cst_20 : f32 to vector<2x256xf32>
    %38 = arith.maximumf %36, %37 : vector<2x256xf32>
    %c3_i32_21 = arith.constant 3 : i32
    %39 = tpu.memref_slice %arg15[%c3_i32_21] : memref<4x!tpu.dma_semaphore, #tpu.memory_space<semaphore_mem>> -> memref<1x!tpu.dma_semaphore, #tpu.memory_space<semaphore_mem>>
    %40 = tpu.memref_squeeze %39 : memref<1x!tpu.dma_semaphore, #tpu.memory_space<semaphore_mem>> -> memref<!tpu.dma_semaphore, #tpu.memory_space<semaphore_mem>>
    tpu.wait_dma2 semaphore(%40 : memref<!tpu.dma_semaphore, #tpu.memory_space<semaphore_mem>>) src(%arg4 : memref<256x256xbf16, #tpu.memory_space<any>>) dst(%arg14 : memref<256x256xbf16, #tpu.memory_space<vmem>>)
    %c0_22 = arith.constant 0 : index
    %c0_23 = arith.constant 0 : index
    %41 = vector.load %arg14[%c0_22, %c0_23] : memref<256x256xbf16, #tpu.memory_space<vmem>>, vector<256x256xbf16>
    %c0_24 = arith.constant 0 : index
    %c0_25 = arith.constant 0 : index
    %42 = vector.load %arg8[%c0_24, %c0_25] : memref<1x256xf32, #tpu.memory_space<vmem>>, vector<1x256xf32>
    %43 = arith.truncf %38 : vector<2x256xf32> to vector<2x256xbf16>
    %cst_26 = arith.constant dense<0.000000e+00> : vector<2x256xf32>
    %44 = tpu.matmul %43, %41, %cst_26 {dimension_numbers = #tpu.dot_dimension_numbers<[1], [0], [0], [1], [0, 0, 1, 1], [], []>} : vector<2x256xbf16>, vector<256x256xbf16>, vector<2x256xf32> -> vector<2x256xf32>
    %45 = vector.broadcast %42 : vector<1x256xf32> to vector<2x256xf32>
    %46 = arith.addf %44, %45 : vector<2x256xf32>
    %cst_27 = arith.constant 0.000000e+00 : f32
    %47 = vector.broadcast %cst_27 : f32 to vector<2x256xf32>
    %48 = arith.maximumf %46, %47 : vector<2x256xf32>
    %49 = vector.extract_strided_slice %48 {offsets = [0, 0], sizes = [2, 32], strides = [1, 1]} : vector<2x256xf32> to vector<2x32xf32>
    %c0_28 = arith.constant 0 : index
    %c0_29 = arith.constant 0 : index
    %50 = vector.load %arg16[%c0_28, %c0_29] : memref<16x32xf32, #tpu.memory_space<vmem>>, vector<2x32xf32>
    tpu.vector_store %arg16[%c0_28, %c0_29], %49 {strides = array<i32>} : memref<16x32xf32, #tpu.memory_space<vmem>>, vector<2x32xf32>,
    %51 = vector.extract_strided_slice %48 {offsets = [0, 32], sizes = [2, 32], strides = [1, 1]} : vector<2x256xf32> to vector<2x32xf32>
    %c2 = arith.constant 2 : index
    %c0_30 = arith.constant 0 : index
    %52 = vector.load %arg16[%c2, %c0_30] : memref<16x32xf32, #tpu.memory_space<vmem>>, vector<2x32xf32>
    tpu.vector_store %arg16[%c2, %c0_30], %51 {strides = array<i32>} : memref<16x32xf32, #tpu.memory_space<vmem>>, vector<2x32xf32>,
    %53 = vector.extract_strided_slice %48 {offsets = [0, 64], sizes = [2, 32], strides = [1, 1]} : vector<2x256xf32> to vector<2x32xf32>
    %c4 = arith.constant 4 : index
    %c0_31 = arith.constant 0 : index
    %54 = vector.load %arg16[%c4, %c0_31] : memref<16x32xf32, #tpu.memory_space<vmem>>, vector<2x32xf32>
    tpu.vector_store %arg16[%c4, %c0_31], %53 {strides = array<i32>} : memref<16x32xf32, #tpu.memory_space<vmem>>, vector<2x32xf32>,
    %55 = vector.extract_strided_slice %48 {offsets = [0, 96], sizes = [2, 32], strides = [1, 1]} : vector<2x256xf32> to vector<2x32xf32>
    %c6 = arith.constant 6 : index
    %c0_32 = arith.constant 0 : index
    %56 = vector.load %arg16[%c6, %c0_32] : memref<16x32xf32, #tpu.memory_space<vmem>>, vector<2x32xf32>
    tpu.vector_store %arg16[%c6, %c0_32], %55 {strides = array<i32>} : memref<16x32xf32, #tpu.memory_space<vmem>>, vector<2x32xf32>,
    %57 = vector.extract_strided_slice %48 {offsets = [0, 128], sizes = [2, 32], strides = [1, 1]} : vector<2x256xf32> to vector<2x32xf32>
    %c8 = arith.constant 8 : index
    %c0_33 = arith.constant 0 : index
    %58 = vector.load %arg16[%c8, %c0_33] : memref<16x32xf32, #tpu.memory_space<vmem>>, vector<2x32xf32>
    tpu.vector_store %arg16[%c8, %c0_33], %57 {strides = array<i32>} : memref<16x32xf32, #tpu.memory_space<vmem>>, vector<2x32xf32>,
    %59 = vector.extract_strided_slice %48 {offsets = [0, 160], sizes = [2, 32], strides = [1, 1]} : vector<2x256xf32> to vector<2x32xf32>
    %c10 = arith.constant 10 : index
    %c0_34 = arith.constant 0 : index
    %60 = vector.load %arg16[%c10, %c0_34] : memref<16x32xf32, #tpu.memory_space<vmem>>, vector<2x32xf32>
    tpu.vector_store %arg16[%c10, %c0_34], %59 {strides = array<i32>} : memref<16x32xf32, #tpu.memory_space<vmem>>, vector<2x32xf32>,
    %61 = vector.extract_strided_slice %48 {offsets = [0, 192], sizes = [2, 32], strides = [1, 1]} : vector<2x256xf32> to vector<2x32xf32>
    %c12 = arith.constant 12 : index
    %c0_35 = arith.constant 0 : index
    %62 = vector.load %arg16[%c12, %c0_35] : memref<16x32xf32, #tpu.memory_space<vmem>>, vector<2x32xf32>
    tpu.vector_store %arg16[%c12, %c0_35], %61 {strides = array<i32>} : memref<16x32xf32, #tpu.memory_space<vmem>>, vector<2x32xf32>,
    %63 = vector.extract_strided_slice %48 {offsets = [0, 224], sizes = [2, 32], strides = [1, 1]} : vector<2x256xf32> to vector<2x32xf32>
    %c14 = arith.constant 14 : index
    %c0_36 = arith.constant 0 : index
    %64 = vector.load %arg16[%c14, %c0_36] : memref<16x32xf32, #tpu.memory_space<vmem>>, vector<2x32xf32>
    tpu.vector_store %arg16[%c14, %c0_36], %63 {strides = array<i32>} : memref<16x32xf32, #tpu.memory_space<vmem>>, vector<2x32xf32>,
    %c0_37 = arith.constant 0 : index
    %c0_38 = arith.constant 0 : index
    %65 = vector.load %arg9[%c0_37, %c0_38] : memref<32x32xf32, #tpu.memory_space<vmem>>, vector<32x32xf32>
    %c0_39 = arith.constant 0 : index
    %c0_40 = arith.constant 0 : index
    %66 = vector.load %arg16[%c0_39, %c0_40] : memref<16x32xf32, #tpu.memory_space<vmem>>, vector<16x32xf32>
    %cst_41 = arith.constant dense<0.000000e+00> : vector<16x32xf32>
    %67 = tpu.matmul %66, %65, %cst_41 {dimension_numbers = #tpu.dot_dimension_numbers<[1], [0], [0], [1], [0, 0, 1, 1], [], []>} : vector<16x32xf32>, vector<32x32xf32>, vector<16x32xf32> -> vector<16x32xf32>
    %c0_42 = arith.constant 0 : index
    %c0_43 = arith.constant 0 : index
    %68 = vector.load %arg17[%c0_42, %c0_43] : memref<16x32xf32, #tpu.memory_space<vmem>>, vector<16x32xf32>
    tpu.vector_store %arg17[%c0_42, %c0_43], %67 {strides = array<i32>} : memref<16x32xf32, #tpu.memory_space<vmem>>, vector<16x32xf32>,
    %c0_44 = arith.constant 0 : index
    %c0_45 = arith.constant 0 : index
    %69 = tpu.strided_load %arg16[%c0_44, %c0_45] {strides = array<i32: 2, 1>} : memref<16x32xf32, #tpu.memory_space<vmem>>, vector<8x32xf32>
    %c0_46 = arith.constant 0 : index
    %c0_47 = arith.constant 0 : index
    %70 = tpu.strided_load %arg17[%c0_46, %c0_47] {strides = array<i32: 2, 1>} : memref<16x32xf32, #tpu.memory_space<vmem>>, vector<8x32xf32>
    %cst_48 = arith.constant dense<0.000000e+00> : vector<8x8xf32>
    %71 = tpu.matmul %70, %69, %cst_48 {dimension_numbers = #tpu.dot_dimension_numbers<[1], [1], [0], [0], [0, 0, 1, 0], [], []>} : vector<8x32xf32>, vector<8x32xf32>, vector<8x8xf32> -> vector<8x8xf32>
    %c1 = arith.constant 1 : index
    %c0_49 = arith.constant 0 : index
    %72 = tpu.strided_load %arg16[%c1, %c0_49] {strides = array<i32: 2, 1>} : memref<16x32xf32, #tpu.memory_space<vmem>>, vector<8x32xf32>
    %c1_50 = arith.constant 1 : index
    %c0_51 = arith.constant 0 : index
    %73 = tpu.strided_load %arg17[%c1_50, %c0_51] {strides = array<i32: 2, 1>} : memref<16x32xf32, #tpu.memory_space<vmem>>, vector<8x32xf32>
    %cst_52 = arith.constant dense<0.000000e+00> : vector<8x8xf32>
    %74 = tpu.matmul %73, %72, %cst_52 {dimension_numbers = #tpu.dot_dimension_numbers<[1], [1], [0], [0], [0, 0, 1, 0], [], []>} : vector<8x32xf32>, vector<8x32xf32>, vector<8x8xf32> -> vector<8x8xf32>
    %75 = vector.shape_cast %71 : vector<8x8xf32> to vector<1x8x8xf32>
    %76 = vector.shape_cast %74 : vector<8x8xf32> to vector<1x8x8xf32>
    %77 = tpu.concatenate %75, %76 in 0 : vector<1x8x8xf32>, vector<1x8x8xf32> -> vector<2x8x8xf32>
    %c0_53 = arith.constant 0 : index
    %c0_54 = arith.constant 0 : index
    %c0_55 = arith.constant 0 : index
    %78 = vector.load %arg10[%c0_53, %c0_54, %c0_55] : memref<2x8x8xf32, #tpu.memory_space<vmem>>, vector<2x8x8xf32>
    tpu.vector_store %arg10[%c0_53, %c0_54, %c0_55], %77 {strides = array<i32>} : memref<2x8x8xf32, #tpu.memory_space<vmem>>, vector<2x8x8xf32>,
    return
  }
}

</mosaic_0001>

<bundles_post_ra>
// kernel: tpu_custom_call.1
= control target key start
LH: loop header
LB: loop body
LE: loop exit
PB: predicated region body
PF: predicated region fallthrough
CT: control target
= control target key end

     0   :  { %15 = vsyncpa [#allocation10], 0  ;;  %s1924_s0 = inlined_call_operand.hbm [shape: f32[2,128], index: 0, kind: input, shape index: {}]   ;;  %s1925_s1 = inlined_call_operand.hbm [shape: bf16[128,256], index: 1, kind: input, shape index: {}]   ;;  %s1926_s2 = inlined_call_operand.hbm [shape: bf16[256,1024], index: 2, kind: input, shape index: {}]   ;;  %s1927_s3 = inlined_call_operand.hbm [shape: bf16[1024,256], index: 3, kind: input, shape index: {}]   ;;  %s1928_s4 = inlined_call_operand.hbm [shape: bf16[256,256], index: 4, kind: input, shape index: {}]   ;;  %s1929_s5 = inlined_call_operand.vmem [shape: f32[1,256], index: 5, kind: input, shape index: {}]   ;;  %s1930_s6 = inlined_call_operand.hbm [shape: f32[1,1024], index: 6, kind: input, shape index: {}]   ;;  %s1931_s7 = inlined_call_operand.hbm [shape: f32[1,256], index: 7, kind: input, shape index: {}]   ;;  %s1932_s8 = inlined_call_operand.hbm [shape: f32[1,256], index: 8, kind: input, shape index: {}]   ;;  %s1933_s9 = inlined_call_operand.vmem [shape: f32[32,32], index: 9, kind: input, shape index: {}]   ;;  %s1934_s10 = inlined_call_operand.hbm [shape: f32[2,8,8], index: 10, kind: output, shape index: {}]  }
   0x1   :  { %16 = vsyncpa [#allocation13], 0 }
   0x2   :  { %17 = vsyncpa [#allocation16], 0 }
   0x3   :  { %18 = vsyncpa [#allocation11], 0  ;;  %s1604_s13 = smov [#allocation12]   ;;  %s1605_s15 = smov [#allocation9]  }
   0x4   :  { %s37_s14 = sshll.u32 %s1604_s13, 4  ;;  %s25_s16 = sshll.u32 %s1605_s15, 4  ;;  %s38_s14 = int_to_ptr.vmem [resolvable:$true] %s37_s14  ;;  %s26_s16 = int_to_ptr.vmem [resolvable:$true] %s25_s16 }
   0x5   :  { %s1478_s19 = scalar_lea.hbm %s1930_s6, 128 }
   0x6   :  { %p1479_p0 = scmp.ne.s32.totalorder %s1930_s6, %s1478_s19  ;;  %p1482_p1 = scmp.lt.u32.totalorder %s1478_s19, %s1930_s6 }
   0x8   :  { %p1484_p2 = pnand %p1482_p1, %p1479_p0 }
   0xa   :  { %1487 = shalt.err (!%p1484_p2)
}
   0xb   :  { %s1488_s24 = scalar_lea.vmem %s38_s14, 128  ;;  %p1493_p4 = scmp.lt.s32.totalorder %s38_s14, %s38_s14 }
   0xc   :  { %p1489_p3 = scmp.ne.s32.totalorder %s38_s14, %s1488_s24  ;;  %p1494_p5 = scmp.lt.s32.totalorder %s1488_s24, %s1488_s24 }
   0xe   :  { %p1495_p6 = por %p1494_p5, %p1493_p4 }
  0x10   :  { %p1496_p7 = pnand %p1495_p6, %p1489_p3 }
  0x12   :  { %1499 = shalt.err (!%p1496_p7)
}
  0x13   :  { %40 = dma.hbm_to_vmem [thread:$0]  %s1930_s6, 128, %s38_s14, [#allocation13]  }
  0x14   :  { %s1500_s29 = scalar_lea.hbm %s1924_s0, 32 }
  0x15   :  { %p1501_p8 = scmp.ne.s32.totalorder %s1924_s0, %s1500_s29  ;;  %p1504_p9 = scmp.lt.u32.totalorder %s1500_s29, %s1924_s0 }
  0x17   :  { %p1506_p10 = pnand %p1504_p9, %p1501_p8 }
  0x19   :  { %1509 = shalt.err (!%p1506_p10)
}
  0x1a   :  { %s1510_s15 = scalar_lea.vmem %s26_s16, 32  ;;  %p1515_p12 = scmp.lt.s32.totalorder %s26_s16, %s26_s16 }
  0x1b   :  { %p1511_p11 = scmp.ne.s32.totalorder %s26_s16, %s1510_s15  ;;  %p1516_p13 = scmp.lt.s32.totalorder %s1510_s15, %s1510_s15 }
  0x1d   :  { %p1517_p0 = por %p1516_p13, %p1515_p12 }
  0x1f   :  { %p1518_p1 = pnand %p1517_p0, %p1511_p11 }
  0x21   :  { %1521 = shalt.err (!%p1518_p1)
}
  0x22   :  { %28 = dma.hbm_to_vmem [thread:$0]  %s1924_s0, 32, %s26_s16, [#allocation10]  }
  0x23   :  { %s1606_s17 = smov [#allocation14]   ;;  %s1607_s19 = smov [#allocation15]  }
  0x24   :  { %s47_s18 = sshll.u32 %s1606_s17, 4  ;;  %s57_s20 = sshll.u32 %s1607_s19, 4  ;;  %s48_s18 = int_to_ptr.vmem [resolvable:$true] %s47_s18  ;;  %s58_s20 = int_to_ptr.vmem [resolvable:$true] %s57_s20 }
  0x25   :  { %s1522_s23 = scalar_lea.hbm %s1931_s7, 32 }
  0x26   :  { %p1523_p2 = scmp.ne.s32.totalorder %s1931_s7, %s1522_s23  ;;  %p1526_p3 = scmp.lt.u32.totalorder %s1522_s23, %s1931_s7 }
  0x28   :  { %p1528_p4 = pnand %p1526_p3, %p1523_p2 }
  0x2a   :  { %1531 = shalt.err (!%p1528_p4)
}
  0x2b   :  { %s1532_s0 = scalar_lea.vmem %s48_s18, 32  ;;  %p1537_p6 = scmp.lt.s32.totalorder %s48_s18, %s48_s18 }
  0x2c   :  { %p1533_p5 = scmp.ne.s32.totalorder %s48_s18, %s1532_s0  ;;  %p1538_p7 = scmp.lt.s32.totalorder %s1532_s0, %s1532_s0 }
  0x2e   :  { %p1539_p8 = por %p1538_p7, %p1537_p6 }
  0x30   :  { %p1540_p9 = pnand %p1539_p8, %p1533_p5 }
  0x32   :  { %1543 = shalt.err (!%p1540_p9)
}
  0x33   :  { %50 = dma.hbm_to_vmem [thread:$0]  %s1931_s7, 32, %s48_s18, [#allocation13]  }
  0x34   :  { %s1544_s11 = scalar_lea.hbm %s1932_s8, 32 }
  0x35   :  { %p1545_p10 = scmp.ne.s32.totalorder %s1932_s8, %s1544_s11  ;;  %p1548_p11 = scmp.lt.u32.totalorder %s1544_s11, %s1932_s8 }
  0x37   :  { %p1550_p12 = pnand %p1548_p11, %p1545_p10 }
  0x39   :  { %1553 = shalt.err (!%p1550_p12)
}
  0x3a   :  { %s1554_s14 = scalar_lea.vmem %s58_s20, 32  ;;  %p1559_p0 = scmp.lt.s32.totalorder %s58_s20, %s58_s20 }
  0x3b   :  { %p1555_p13 = scmp.ne.s32.totalorder %s58_s20, %s1554_s14  ;;  %p1560_p1 = scmp.lt.s32.totalorder %s1554_s14, %s1554_s14 }
  0x3d   :  { %p1561_p2 = por %p1560_p1, %p1559_p0 }
  0x3f   :  { %p1562_p3 = pnand %p1561_p2, %p1555_p13 }
  0x41   :  { %1565 = shalt.err (!%p1562_p3)
}
  0x42   :  { %60 = dma.hbm_to_vmem [thread:$0]  %s1932_s8, 32, %s58_s20, [#allocation16]  }
  0x43   :  { %1588 = dma.done.wait [#allocation10], 32  }
  0x44   :  { %1589 = vsyncadd [#allocation10], 4294967264 }
  0x45   :  { %1590 = dma.done.wait [#allocation13], 160  }
  0x46   :  { %1591 = vsyncadd [#allocation13], 4294967136 }
  0x47   :  { %1592 = dma.done.wait [#allocation16], 32  }
  0x48   :  { %1593 = vsyncadd [#allocation16], 4294967264  ;;  %s80_s18 = sld [smem:[#allocation0]]   ;;  %s1608_s19 = smov 256  }
  0x49   :  { %92 = sst [smem:[#allocation19]] %s1608_s19  ;;  %s1609_s21 = smov 2  }
  0x4a   :  { %94 = sst [smem:[#allocation19 + $0x1]] %s1608_s19  ;;  %s1610_s22 = smov 64  }
  0x4b   :  { %96 = sst [smem:[#allocation19 + $0x2]] %s1609_s21  ;;  %s1611_s23 = smov 128  }
  0x4c   :  { %98 = sst [smem:[#allocation19 + $0x3]] %s1610_s22  ;;  %s1612_s8 = smov [#allocation2]  }
  0x4d   :  { %100 = sst [smem:[#allocation19 + $0x4]] %s1611_s23  ;;  %s88_s20 = sshll.u32 %s1612_s8, 4  ;;  %s89_s20 = int_to_ptr.vmem [resolvable:$true] %s88_s20 }
  0x4e   :  { %102 = sst [smem:[#allocation19 + $0x5]] %s1609_s21  ;;  %s1377_s24 = sshll.u32 %s80_s18, 26 }
  0x4f   :  { %104 = sst [smem:[#allocation19 + $0x6]] %s1611_s23  ;;  %s1744_s25 = sadd.s32 134217728, %s1377_s24 }
  0x50   :  { %106 = sst [smem:[#allocation19 + $0x7]] %s1610_s22  ;;  %s1613_s26 = smov 4  }
  0x51   :  { %108 = sst [smem:[#allocation19 + $0x8]] %s1613_s26  ;;  %s1614_s27 = smov [#allocation6]  }
  0x52   :  { %s1615_s0 = smov [#allocation18]   ;;  %s1616_s29 = smov 1024  }
  0x53   :  { %110 = dma.general %s1925_s1, 2048, %s89_s20, %s1614_s27, %s1615_s0, [#allocation19], %s1744_s25, 0  }
  0x54   :  { %127 = sst [smem:[#allocation21]] %s1616_s29  ;;  %s1617_s30 = smov 8  }
  0x55   :  { %129 = sst [smem:[#allocation21 + $0x1]] %s1616_s29  ;;  %s1618_s11 = smov [#allocation3]  }
  0x56   :  { %131 = sst [smem:[#allocation21 + $0x2]] %s1617_s30  ;;  %s123_s12 = sshll.u32 %s1618_s11, 4  ;;  %s124_s12 = int_to_ptr.vmem [resolvable:$true] %s123_s12 }
  0x57   :  { %133 = sst [smem:[#allocation21 + $0x3]] %s1610_s22  ;;  %s1619_s13 = smov 512  }
  0x58   :  { %135 = sst [smem:[#allocation21 + $0x4]] %s1611_s23  ;;  %s1620_s1 = smov [#allocation6 + $0x1]  }
  0x59   :  { %137 = sst [smem:[#allocation21 + $0x5]] %s1609_s21  ;;  %s1621_s15 = smov [#allocation20]  }
  0x5a   :  { %139 = sst [smem:[#allocation21 + $0x6]] %s1619_s13  ;;  %s1622_s7 = smov [#allocation4]  }
  0x5b   :  { %141 = sst [smem:[#allocation21 + $0x7]] %s1610_s22  ;;  %s158_s17 = sshll.u32 %s1622_s7, 4  ;;  %s159_s17 = int_to_ptr.vmem [resolvable:$true] %s158_s17 }
  0x5c   :  { %143 = sst [smem:[#allocation21 + $0x8]] %s1613_s26  ;;  %s1624_s18 = smov [#allocation22]  }
  0x5d   :  { %145 = dma.general %s1926_s2, 16384, %s124_s12, %s1620_s1, %s1621_s15, [#allocation21], %s1744_s25, 0  }
  0x5e   :  { %162 = sst [smem:[#allocation23]] %s1608_s19  ;;  %s1623_s2 = smov [#allocation6 + $0x2]  }
  0x5f   :  { %164 = sst [smem:[#allocation23 + $0x1]] %s1608_s19  ;;  %s1625_s24 = smov [#allocation5]  }
  0x60   :  { %166 = sst [smem:[#allocation23 + $0x2]] %s1609_s21  ;;  %s193_s27 = sshll.u32 %s1625_s24, 4  ;;  %s194_s27 = int_to_ptr.vmem [resolvable:$true] %s193_s27 }
  0x61   :  { %168 = sst [smem:[#allocation23 + $0x3]] %s1610_s22  ;;  %s1627_s0 = smov [#allocation24]  }
  0x62   :  { %170 = sst [smem:[#allocation23 + $0x4]] %s1611_s23 }
  0x63   :  { %172 = sst [smem:[#allocation23 + $0x5]] %s1609_s21 }
  0x64   :  { %174 = sst [smem:[#allocation23 + $0x6]] %s1611_s23 }
  0x65   :  { %176 = sst [smem:[#allocation23 + $0x7]] %s1610_s22 }
  0x66   :  { %178 = sst [smem:[#allocation23 + $0x8]] %s1613_s26 }
  0x67   :  { %180 = dma.general %s1927_s3, 16384, %s159_s17, %s1623_s2, %s1624_s18, [#allocation23], %s1744_s25, 0  }
  0x68   :  { %197 = sst [smem:[#allocation25]] %s1608_s19  ;;  %s1626_s3 = smov [#allocation6 + $0x3]  }
  0x69   :  { %199 = sst [smem:[#allocation25 + $0x1]] %s1608_s19 }
  0x6a   :  { %201 = sst [smem:[#allocation25 + $0x2]] %s1609_s21 }
  0x6b   :  { %203 = sst [smem:[#allocation25 + $0x3]] %s1610_s22 }
  0x6c   :  { %205 = sst [smem:[#allocation25 + $0x4]] %s1611_s23 }
  0x6d   :  { %207 = sst [smem:[#allocation25 + $0x5]] %s1609_s21 }
  0x6e   :  { %209 = sst [smem:[#allocation25 + $0x6]] %s1611_s23 }
  0x6f   :  { %211 = sst [smem:[#allocation25 + $0x7]] %s1610_s22 }
  0x70   :  { %213 = sst [smem:[#allocation25 + $0x8]] %s1613_s26 }
  0x71   :  { %215 = dma.general %s1928_s4, 4096, %s194_s27, %s1626_s3, %s1627_s0, [#allocation25], %s1744_s25, 0  }
  0x72   :  { %v216_v0 = vld [vmem:[#allocation9] sm:$0x3] }
  0x73   :  { %1594 = dma.done.wait [#allocation6], 2048 }
  0x74   :  { %1595 = vsyncadd [#allocation6], 4294965248  ;;  %v1628_v1 = vmov 0   ;;  %v222_v2 = vld [vmem:[#allocation2 + $0x8] sm:$0xff]  ;;  %v221_v3 = vld [vmem:[#allocation2] sm:$0xff]  ;;  %v238_v18 = vpack.c.bf16 %v216_v0, %v216_v0  ;;  %v240_v19 = vlaneseq }
  0x75   :  { %282 = vmatprep.mubr.bf16.mxu0 %v1628_v1  ;;  %v224_v4 = vld [vmem:[#allocation2 + $0x18] sm:$0xff]  ;;  %250 = vmatprep.subr.bf16.mxu0 %v222_v2  ;;  %v223_v5 = vld [vmem:[#allocation2 + $0x10] sm:$0xff]  ;;  %v226_v6 = vld [vmem:[#allocation2 + $0x28] sm:$0xff] }
  0x76   :  { %251 = vmatpush1.bf16.msra.mxu0 %v221_v3  ;;  %v225_v7 = vld [vmem:[#allocation2 + $0x20] sm:$0xff]  ;;  %v228_v8 = vld [vmem:[#allocation2 + $0x38] sm:$0xff]  ;;  %v227_v9 = vld [vmem:[#allocation2 + $0x30] sm:$0xff]  ;;  %v1788_v20 = vshrl.u32 %v240_v19, 7 }
  0x77   :  { %252 = vmatprep.subr.bf16.mxu0 %v224_v4  ;;  %v230_v10 = vld [vmem:[#allocation2 + $0x48] sm:$0xff]  ;;  %v229_v11 = vld [vmem:[#allocation2 + $0x40] sm:$0xff]  ;;  %v232_v12 = vld [vmem:[#allocation2 + $0x58] sm:$0xff] }
  0x78   :  { %v231_v13 = vld [vmem:[#allocation2 + $0x50] sm:$0xff]  ;;  %v234_v14 = vld [vmem:[#allocation2 + $0x68] sm:$0xff]  ;;  %v233_v15 = vld [vmem:[#allocation2 + $0x60] sm:$0xff]  ;;  %v1791_v21 = vsub.s32 0, %v1788_v20  ;;  %v1797_v23 = vsub.s32 1, %v1788_v20 }
  0x79   :  { %v236_v16 = vld [vmem:[#allocation2 + $0x78] sm:$0xff]  ;;  %v235_v17 = vld [vmem:[#allocation2 + $0x70] sm:$0xff]  ;;  %v237_v22 = vld [vmem:[%s1929_s5] sm:$0x3] }
  0x7a   :  { %253 = vmatpush1.bf16.msra.mxu0 %v223_v5  ;;  %v243_v24 = vrot.slane %v237_v22, %v1791_v21  ;;  %v247_v25 = vrot.slane %v237_v22, %v1797_v23 }
  0x7b   :  { %254 = vmatprep.subr.bf16.mxu0 %v226_v6 }
  0x7e   :  { %255 = vmatpush1.bf16.msra.mxu0 %v225_v7 }
  0x7f   :  { %256 = vmatprep.subr.bf16.mxu0 %v228_v8 }
  0x82   :  { %257 = vmatpush1.bf16.msra.mxu0 %v227_v9 }
  0x83   :  { %258 = vmatprep.subr.bf16.mxu0 %v230_v10 }
  0x86   :  { %259 = vmatpush1.bf16.msra.mxu0 %v229_v11 }
  0x87   :  { %260 = vmatprep.subr.bf16.mxu0 %v232_v12 }
  0x8a   :  { %261 = vmatpush1.bf16.msra.mxu0 %v231_v13 }
  0x8b   :  { %262 = vmatprep.subr.bf16.mxu0 %v234_v14 }
  0x8e   :  { %263 = vmatpush1.bf16.msra.mxu0 %v233_v15 }
  0x8f   :  { %264 = vmatprep.subr.bf16.mxu0 %v236_v16 }
  0x92   :  { %265 = vmatpush1.bf16.msra.mxu0 %v235_v17 }
  0x95   :  { %283 = vmatmul.mubr.bf16.vlgmr.msra.gmra.mrb[0].mxu0 %v238_v18 }
 0x168   :  { %v284_v26 = vpop.f32.mrb[0].mxu0 }
 0x169   :  { %v1801_v27 = vadd.f32 %v284_v26, %v243_v24  ;;  %v286_v28 = vpop.f32.mrb[1].mxu0 }
 0x16a   :  { %v287_v29 = vadd.f32 %v286_v28, %v247_v25  ;;  %v288_v30 = vpop.f32.mrb[2].mxu0 }
 0x16b   :  { %v291_v31 = vmax.f32 %v1801_v27, 0.0  ;;  %v289_v32 = vpop.f32.mrb[3].mxu0 }
 0x16c   :  { %v292_v33 = vmax.f32 %v287_v29, 0.0 }
 0x16d   :  { %1596 = dma.done.wait [#allocation6 + $0x1], 16384 }
 0x16e   :  { %1597 = vsyncadd [#allocation6 + $0x1], 4294950912  ;;  %v1804_v34 = vpack.c.bf16 %v292_v33, %v292_v33  ;;  %v298_v35 = vld [vmem:[#allocation3 + $0x8] sm:$0xff]  ;;  %v297_v36 = vld [vmem:[#allocation3] sm:$0xff]  ;;  %v1811_v30 = vpack.c.bf16 %v291_v31, %v291_v31 }
 0x16f   :  { %v306_v37 = vld [vmem:[#allocation3 + $0x48] sm:$0xff]  ;;  %469 = vmatprep.subr.bf16.mxu0 %v298_v35  ;;  %v305_v38 = vld [vmem:[#allocation3 + $0x40] sm:$0xff]  ;;  %v300_v28 = vld [vmem:[#allocation3 + $0x18] sm:$0xff] }
 0x170   :  { %501 = vmatprep.mubr.bf16.mxu0 %v1804_v34  ;;  %583 = vmatprep.mubr.bf16.mxu1 %v1804_v34  ;;  %v314_v39 = vld [vmem:[#allocation3 + $0x88] sm:$0xff]  ;;  %v313_v40 = vld [vmem:[#allocation3 + $0x80] sm:$0xff]  ;;  %v299_v33 = vld [vmem:[#allocation3 + $0x10] sm:$0xff] }
 0x171   :  { %470 = vmatpush1.bf16.msra.mxu0 %v297_v36  ;;  %v322_v41 = vld [vmem:[#allocation3 + $0xc8] sm:$0xff]  ;;  %v321_v42 = vld [vmem:[#allocation3 + $0xc0] sm:$0xff]  ;;  %v308_v35 = vld [vmem:[#allocation3 + $0x58] sm:$0xff] }
 0x172   :  { %471 = vmatprep.subr.bf16.mxu0 %v306_v37  ;;  %v330_v43 = vld [vmem:[#allocation3 + $0x108] sm:$0xff]  ;;  %v329_v44 = vld [vmem:[#allocation3 + $0x100] sm:$0xff]  ;;  %v316_v27 = vld [vmem:[#allocation3 + $0x98] sm:$0xff] }
 0x173   :  { %v338_v45 = vld [vmem:[#allocation3 + $0x148] sm:$0xff]  ;;  %v337_v46 = vld [vmem:[#allocation3 + $0x140] sm:$0xff] }
 0x174   :  { %v346_v47 = vld [vmem:[#allocation3 + $0x188] sm:$0xff]  ;;  %v301_v49 = vld [vmem:[#allocation3 + $0x20] sm:$0xff] }
 0x175   :  { %472 = vmatpush1.bf16.msra.mxu0 %v305_v38  ;;  %v302_v48 = vld [vmem:[#allocation3 + $0x28] sm:$0xff]  ;;  %v345_v51 = vld [vmem:[#allocation3 + $0x180] sm:$0xff]  ;;  %v307_v38 = vld [vmem:[#allocation3 + $0x50] sm:$0xff] }
 0x176   :  { %473 = vmatprep.subr.bf16.mxu0 %v314_v39  ;;  %551 = vmatprep.subr.bf16.mxu1 %v302_v48  ;;  %v310_v50 = vld [vmem:[#allocation3 + $0x68] sm:$0xff]  ;;  %v309_v53 = vld [vmem:[#allocation3 + $0x60] sm:$0xff]  ;;  %v331_v48 = vld [vmem:[#allocation3 + $0x110] sm:$0xff] }
 0x177   :  { %552 = vmatpush1.bf16.msra.mxu1 %v301_v49  ;;  %v354_v52 = vld [vmem:[#allocation3 + $0x1c8] sm:$0xff]  ;;  %v353_v55 = vld [vmem:[#allocation3 + $0x1c0] sm:$0xff]  ;;  %v340_v49 = vld [vmem:[#allocation3 + $0x158] sm:$0xff] }
 0x178   :  { %553 = vmatprep.subr.bf16.mxu1 %v310_v50  ;;  %v318_v54 = vld [vmem:[#allocation3 + $0xa8] sm:$0xff]  ;;  %v317_v57 = vld [vmem:[#allocation3 + $0xa0] sm:$0xff] }
 0x179   :  { %474 = vmatpush1.bf16.msra.mxu0 %v313_v40  ;;  %v362_v56 = vld [vmem:[#allocation3 + $0x208] sm:$0xff]  ;;  %v361_v59 = vld [vmem:[#allocation3 + $0x200] sm:$0xff]  ;;  %v315_v40 = vld [vmem:[#allocation3 + $0x90] sm:$0xff] }
 0x17a   :  { %475 = vmatprep.subr.bf16.mxu0 %v322_v41  ;;  %v326_v58 = vld [vmem:[#allocation3 + $0xe8] sm:$0xff]  ;;  %v325_v61 = vld [vmem:[#allocation3 + $0xe0] sm:$0xff]  ;;  %v324_v41 = vld [vmem:[#allocation3 + $0xd8] sm:$0xff] }
 0x17b   :  { %554 = vmatpush1.bf16.msra.mxu1 %v309_v53  ;;  %v370_v60 = vld [vmem:[#allocation3 + $0x248] sm:$0xff]  ;;  %v369_v63 = vld [vmem:[#allocation3 + $0x240] sm:$0xff]  ;;  %v347_v53 = vld [vmem:[#allocation3 + $0x190] sm:$0xff] }
 0x17c   :  { %555 = vmatprep.subr.bf16.mxu1 %v318_v54  ;;  %v334_v62 = vld [vmem:[#allocation3 + $0x128] sm:$0xff]  ;;  %v333_v1 = vld [vmem:[#allocation3 + $0x120] sm:$0xff]  ;;  %v356_v54 = vld [vmem:[#allocation3 + $0x1d8] sm:$0xff] }
 0x17d   :  { %476 = vmatpush1.bf16.msra.mxu0 %v321_v42  ;;  %v378_v0 = vld [vmem:[#allocation3 + $0x288] sm:$0xff]  ;;  %v377_v3 = vld [vmem:[#allocation3 + $0x280] sm:$0xff] }
 0x17e   :  { %477 = vmatprep.subr.bf16.mxu0 %v330_v43  ;;  %v342_v2 = vld [vmem:[#allocation3 + $0x168] sm:$0xff]  ;;  %v341_v5 = vld [vmem:[#allocation3 + $0x160] sm:$0xff] }
 0x17f   :  { %556 = vmatpush1.bf16.msra.mxu1 %v317_v57  ;;  %v386_v4 = vld [vmem:[#allocation3 + $0x2c8] sm:$0xff]  ;;  %v385_v7 = vld [vmem:[#allocation3 + $0x2c0] sm:$0xff]  ;;  %v363_v57 = vld [vmem:[#allocation3 + $0x210] sm:$0xff] }
 0x180   :  { %557 = vmatprep.subr.bf16.mxu1 %v326_v58  ;;  %v350_v6 = vld [vmem:[#allocation3 + $0x1a8] sm:$0xff]  ;;  %v349_v9 = vld [vmem:[#allocation3 + $0x1a0] sm:$0xff]  ;;  %v372_v58 = vld [vmem:[#allocation3 + $0x258] sm:$0xff] }
 0x181   :  { %478 = vmatpush1.bf16.msra.mxu0 %v329_v44  ;;  %v394_v8 = vld [vmem:[#allocation3 + $0x308] sm:$0xff]  ;;  %v393_v11 = vld [vmem:[#allocation3 + $0x300] sm:$0xff]  ;;  %v323_v44 = vld [vmem:[#allocation3 + $0xd0] sm:$0xff] }
 0x182   :  { %479 = vmatprep.subr.bf16.mxu0 %v338_v45  ;;  %v358_v10 = vld [vmem:[#allocation3 + $0x1e8] sm:$0xff]  ;;  %v357_v13 = vld [vmem:[#allocation3 + $0x1e0] sm:$0xff]  ;;  %v332_v45 = vld [vmem:[#allocation3 + $0x118] sm:$0xff] }
 0x183   :  { %558 = vmatpush1.bf16.msra.mxu1 %v325_v61  ;;  %v402_v12 = vld [vmem:[#allocation3 + $0x348] sm:$0xff]  ;;  %v401_v15 = vld [vmem:[#allocation3 + $0x340] sm:$0xff]  ;;  %v379_v61 = vld [vmem:[#allocation3 + $0x290] sm:$0xff] }
 0x184   :  { %559 = vmatprep.subr.bf16.mxu1 %v334_v62  ;;  %v366_v14 = vld [vmem:[#allocation3 + $0x228] sm:$0xff]  ;;  %v365_v17 = vld [vmem:[#allocation3 + $0x220] sm:$0xff]  ;;  %v388_v62 = vld [vmem:[#allocation3 + $0x2d8] sm:$0xff] }
 0x185   :  { %480 = vmatpush1.bf16.msra.mxu0 %v337_v46  ;;  %v410_v16 = vld [vmem:[#allocation3 + $0x388] sm:$0xff]  ;;  %v409_v19 = vld [vmem:[#allocation3 + $0x380] sm:$0xff] }
 0x186   :  { %481 = vmatprep.subr.bf16.mxu0 %v346_v47  ;;  %v374_v18 = vld [vmem:[#allocation3 + $0x268] sm:$0xff]  ;;  %v373_v24 = vld [vmem:[#allocation3 + $0x260] sm:$0xff] }
 0x187   :  { %560 = vmatpush1.bf16.msra.mxu1 %v333_v1  ;;  %v418_v22 = vld [vmem:[#allocation3 + $0x3c8] sm:$0xff]  ;;  %v417_v26 = vld [vmem:[#allocation3 + $0x3c0] sm:$0xff]  ;;  %v395_v1 = vld [vmem:[#allocation3 + $0x310] sm:$0xff] }
 0x188   :  { %561 = vmatprep.subr.bf16.mxu1 %v342_v2  ;;  %v382_v25 = vld [vmem:[#allocation3 + $0x2a8] sm:$0xff]  ;;  %v381_v29 = vld [vmem:[#allocation3 + $0x2a0] sm:$0xff]  ;;  %v404_v2 = vld [vmem:[#allocation3 + $0x358] sm:$0xff] }
 0x189   :  { %482 = vmatpush1.bf16.msra.mxu0 %v345_v51  ;;  %v390_v32 = vld [vmem:[#allocation3 + $0x2e8] sm:$0xff]  ;;  %v389_v36 = vld [vmem:[#allocation3 + $0x2e0] sm:$0xff]  ;;  %v339_v51 = vld [vmem:[#allocation3 + $0x150] sm:$0xff] }
 0x18a   :  { %483 = vmatprep.subr.bf16.mxu0 %v354_v52  ;;  %v398_v37 = vld [vmem:[#allocation3 + $0x328] sm:$0xff]  ;;  %v397_v31 = vld [vmem:[#allocation3 + $0x320] sm:$0xff]  ;;  %v348_v52 = vld [vmem:[#allocation3 + $0x198] sm:$0xff] }
 0x18b   :  { %562 = vmatpush1.bf16.msra.mxu1 %v341_v5  ;;  %v406_v39 = vld [vmem:[#allocation3 + $0x368] sm:$0xff]  ;;  %v405_v42 = vld [vmem:[#allocation3 + $0x360] sm:$0xff]  ;;  %v411_v5 = vld [vmem:[#allocation3 + $0x390] sm:$0xff] }
 0x18c   :  { %563 = vmatprep.subr.bf16.mxu1 %v350_v6  ;;  %v414_v43 = vld [vmem:[#allocation3 + $0x3a8] sm:$0xff]  ;;  %v413_v46 = vld [vmem:[#allocation3 + $0x3a0] sm:$0xff]  ;;  %v420_v6 = vld [vmem:[#allocation3 + $0x3d8] sm:$0xff] }
 0x18d   :  { %484 = vmatpush1.bf16.msra.mxu0 %v353_v55  ;;  %v422_v47 = vld [vmem:[#allocation3 + $0x3e8] sm:$0xff]  ;;  %v421_v50 = vld [vmem:[#allocation3 + $0x3e0] sm:$0xff]  ;;  %v355_v55 = vld [vmem:[#allocation3 + $0x1d0] sm:$0xff] }
 0x18e   :  { %485 = vmatprep.subr.bf16.mxu0 %v362_v56  ;;  %v364_v56 = vld [vmem:[#allocation3 + $0x218] sm:$0xff] }
 0x18f   :  { %564 = vmatpush1.bf16.msra.mxu1 %v349_v9  ;;  %v303_v9 = vld [vmem:[#allocation3 + $0x30] sm:$0xff] }
 0x190   :  { %565 = vmatprep.subr.bf16.mxu1 %v358_v10  ;;  %v312_v10 = vld [vmem:[#allocation3 + $0x78] sm:$0xff] }
 0x191   :  { %486 = vmatpush1.bf16.msra.mxu0 %v361_v59  ;;  %v371_v59 = vld [vmem:[#allocation3 + $0x250] sm:$0xff] }
 0x192   :  { %487 = vmatprep.subr.bf16.mxu0 %v370_v60  ;;  %v380_v60 = vld [vmem:[#allocation3 + $0x298] sm:$0xff] }
 0x193   :  { %566 = vmatpush1.bf16.msra.mxu1 %v357_v13  ;;  %v319_v13 = vld [vmem:[#allocation3 + $0xb0] sm:$0xff] }
 0x194   :  { %567 = vmatprep.subr.bf16.mxu1 %v366_v14  ;;  %v328_v14 = vld [vmem:[#allocation3 + $0xf8] sm:$0xff] }
 0x195   :  { %488 = vmatpush1.bf16.msra.mxu0 %v369_v63  ;;  %v387_v63 = vld [vmem:[#allocation3 + $0x2d0] sm:$0xff] }
 0x196   :  { %489 = vmatprep.subr.bf16.mxu0 %v378_v0  ;;  %v396_v0 = vld [vmem:[#allocation3 + $0x318] sm:$0xff] }
 0x197   :  { %568 = vmatpush1.bf16.msra.mxu1 %v365_v17  ;;  %v335_v17 = vld [vmem:[#allocation3 + $0x130] sm:$0xff] }
 0x198   :  { %569 = vmatprep.subr.bf16.mxu1 %v374_v18  ;;  %v344_v18 = vld [vmem:[#allocation3 + $0x178] sm:$0xff] }
 0x199   :  { %490 = vmatpush1.bf16.msra.mxu0 %v377_v3  ;;  %v403_v3 = vld [vmem:[#allocation3 + $0x350] sm:$0xff] }
 0x19a   :  { %491 = vmatprep.subr.bf16.mxu0 %v386_v4  ;;  %v412_v4 = vld [vmem:[#allocation3 + $0x398] sm:$0xff] }
 0x19b   :  { %570 = vmatpush1.bf16.msra.mxu1 %v373_v24  ;;  %v360_v24 = vld [vmem:[#allocation3 + $0x1f8] sm:$0xff] }
 0x19c   :  { %571 = vmatprep.subr.bf16.mxu1 %v382_v25  ;;  %v359_v25 = vld [vmem:[#allocation3 + $0x1f0] sm:$0xff] }
 0x19d   :  { %492 = vmatpush1.bf16.msra.mxu0 %v385_v7  ;;  %v419_v7 = vld [vmem:[#allocation3 + $0x3d0] sm:$0xff] }
 0x19e   :  { %493 = vmatprep.subr.bf16.mxu0 %v394_v8  ;;  %v304_v8 = vld [vmem:[#allocation3 + $0x38] sm:$0xff] }
 0x19f   :  { %572 = vmatpush1.bf16.msra.mxu1 %v381_v29  ;;  %v376_v29 = vld [vmem:[#allocation3 + $0x278] sm:$0xff] }
 0x1a0   :  { %573 = vmatprep.subr.bf16.mxu1 %v390_v32  ;;  %v375_v32 = vld [vmem:[#allocation3 + $0x270] sm:$0xff] }
 0x1a1   :  { %494 = vmatpush1.bf16.msra.mxu0 %v393_v11  ;;  %v311_v11 = vld [vmem:[#allocation3 + $0x70] sm:$0xff] }
 0x1a2   :  { %495 = vmatprep.subr.bf16.mxu0 %v402_v12  ;;  %v320_v12 = vld [vmem:[#allocation3 + $0xb8] sm:$0xff] }
 0x1a3   :  { %574 = vmatpush1.bf16.msra.mxu1 %v389_v36  ;;  %v392_v36 = vld [vmem:[#allocation3 + $0x2f8] sm:$0xff] }
 0x1a4   :  { %575 = vmatprep.subr.bf16.mxu1 %v398_v37  ;;  %v391_v37 = vld [vmem:[#allocation3 + $0x2f0] sm:$0xff] }
 0x1a5   :  { %496 = vmatpush1.bf16.msra.mxu0 %v401_v15  ;;  %v327_v15 = vld [vmem:[#allocation3 + $0xf0] sm:$0xff] }
 0x1a6   :  { %497 = vmatprep.subr.bf16.mxu0 %v410_v16  ;;  %v336_v16 = vld [vmem:[#allocation3 + $0x138] sm:$0xff] }
 0x1a7   :  { %576 = vmatpush1.bf16.msra.mxu1 %v397_v31  ;;  %v408_v31 = vld [vmem:[#allocation3 + $0x378] sm:$0xff] }
 0x1a8   :  { %577 = vmatprep.subr.bf16.mxu1 %v406_v39  ;;  %v407_v39 = vld [vmem:[#allocation3 + $0x370] sm:$0xff] }
 0x1a9   :  { %498 = vmatpush1.bf16.msra.mxu0 %v409_v19  ;;  %v343_v19 = vld [vmem:[#allocation3 + $0x170] sm:$0xff] }
 0x1aa   :  { %499 = vmatprep.subr.bf16.mxu0 %v418_v22  ;;  %v352_v22 = vld [vmem:[#allocation3 + $0x1b8] sm:$0xff] }
 0x1ab   :  { %578 = vmatpush1.bf16.msra.mxu1 %v405_v42  ;;  %v424_v42 = vld [vmem:[#allocation3 + $0x3f8] sm:$0xff] }
 0x1ac   :  { %579 = vmatprep.subr.bf16.mxu1 %v414_v43  ;;  %v423_v43 = vld [vmem:[#allocation3 + $0x3f0] sm:$0xff] }
 0x1ad   :  { %500 = vmatpush1.bf16.msra.mxu0 %v417_v26  ;;  %v368_v26 = vld [vmem:[#allocation3 + $0x238] sm:$0xff] }
 0x1ae   :  { %510 = vmatprep.subr.bf16.mxu0 %v300_v28  ;;  %v367_v28 = vld [vmem:[#allocation3 + $0x230] sm:$0xff] }
 0x1af   :  { %580 = vmatpush1.bf16.msra.mxu1 %v413_v46 }
 0x1b0   :  { %502 = vmatmul.mubr.bf16.vlgmr.msra.gmra.mrb[4].mxu0 %v1811_v30  ;;  %581 = vmatprep.subr.bf16.mxu1 %v422_v47 }
 0x1b1   :  { %511 = vmatpush1.bf16.msra.mxu0 %v299_v33  ;;  %542 = vmatprep.mubr.bf16.mxu0 %v1804_v34  ;;  %v384_v33 = vld [vmem:[#allocation3 + $0x2b8] sm:$0xff] }
 0x1b2   :  { %512 = vmatprep.subr.bf16.mxu0 %v308_v35  ;;  %v383_v35 = vld [vmem:[#allocation3 + $0x2b0] sm:$0xff] }
 0x1b3   :  { %582 = vmatpush1.bf16.msra.mxu1 %v421_v50 }
 0x1b5   :  { %513 = vmatpush1.bf16.msra.mxu0 %v307_v38  ;;  %v400_v38 = vld [vmem:[#allocation3 + $0x338] sm:$0xff] }
 0x1b6   :  { %514 = vmatprep.subr.bf16.mxu0 %v316_v27  ;;  %584 = vmatmul.mubr.bf16.vlgmr.msra.gmra.mrb[0].mxu1 %v1811_v30  ;;  %v399_v27 = vld [vmem:[#allocation3 + $0x330] sm:$0xff] }
 0x1b9   :  { %515 = vmatpush1.bf16.msra.mxu0 %v315_v40  ;;  %v416_v40 = vld [vmem:[#allocation3 + $0x3b8] sm:$0xff] }
 0x1ba   :  { %516 = vmatprep.subr.bf16.mxu0 %v324_v41  ;;  %v415_v41 = vld [vmem:[#allocation3 + $0x3b0] sm:$0xff] }
 0x1bd   :  { %517 = vmatpush1.bf16.msra.mxu0 %v323_v44  ;;  %v425_v44 = vld [vmem:[#allocation12] sm:$0xff] }
 0x1be   :  { %518 = vmatprep.subr.bf16.mxu0 %v332_v45  ;;  %v432_v45 = vrot.slane %v425_v44, %v1791_v21  ;;  %v436_v46 = vrot.slane %v425_v44, %v1797_v23 }
 0x1c1   :  { %519 = vmatpush1.bf16.msra.mxu0 %v331_v48 }
 0x1c2   :  { %520 = vmatprep.subr.bf16.mxu0 %v340_v49 }
 0x1c5   :  { %521 = vmatpush1.bf16.msra.mxu0 %v339_v51 }
 0x1c6   :  { %522 = vmatprep.subr.bf16.mxu0 %v348_v52 }
 0x1c9   :  { %523 = vmatpush1.bf16.msra.mxu0 %v347_v53 }
 0x1ca   :  { %524 = vmatprep.subr.bf16.mxu0 %v356_v54 }
 0x1cd   :  { %525 = vmatpush1.bf16.msra.mxu0 %v355_v55  ;;  %v447_v55 = vsub.s32 4, %v1788_v20 }
 0x1ce   :  { %526 = vmatprep.subr.bf16.mxu0 %v364_v56  ;;  %v451_v56 = vsub.s32 5, %v1788_v20 }
 0x1d1   :  { %527 = vmatpush1.bf16.msra.mxu0 %v363_v57  ;;  %v452_v57 = vrot.slane %v425_v44, %v451_v56 }
 0x1d2   :  { %528 = vmatprep.subr.bf16.mxu0 %v372_v58 }
 0x1d5   :  { %529 = vmatpush1.bf16.msra.mxu0 %v371_v59 }
 0x1d6   :  { %530 = vmatprep.subr.bf16.mxu0 %v380_v60 }
 0x1d9   :  { %531 = vmatpush1.bf16.msra.mxu0 %v379_v61 }
 0x1da   :  { %532 = vmatprep.subr.bf16.mxu0 %v388_v62 }
 0x1dd   :  { %533 = vmatpush1.bf16.msra.mxu0 %v387_v63 }
 0x1de   :  { %534 = vmatprep.subr.bf16.mxu0 %v396_v0 }
 0x1e1   :  { %535 = vmatpush1.bf16.msra.mxu0 %v395_v1 }
 0x1e2   :  { %536 = vmatprep.subr.bf16.mxu0 %v404_v2  ;;  %v439_v2 = vsub.s32 2, %v1788_v20 }
 0x1e5   :  { %537 = vmatpush1.bf16.msra.mxu0 %v403_v3  ;;  %v443_v3 = vsub.s32 3, %v1788_v20 }
 0x1e6   :  { %538 = vmatprep.subr.bf16.mxu0 %v412_v4  ;;  %v440_v4 = vrot.slane %v425_v44, %v439_v2 }
 0x1e9   :  { %539 = vmatpush1.bf16.msra.mxu0 %v411_v5  ;;  %v444_v5 = vrot.slane %v425_v44, %v443_v3 }
 0x1ea   :  { %540 = vmatprep.subr.bf16.mxu0 %v420_v6 }
 0x1ed   :  { %541 = vmatpush1.bf16.msra.mxu0 %v419_v7 }
 0x1ee   :  { %592 = vmatprep.subr.bf16.mxu0 %v304_v8 }
 0x1f0   :  { %543 = vmatmul.mubr.bf16.vlgmr.msra.gmra.mrb[8].mxu0 %v1811_v30 }
 0x1f1   :  { %593 = vmatpush1.bf16.msra.mxu0 %v303_v9  ;;  %624 = vmatprep.mubr.bf16.mxu0 %v1804_v34  ;;  %v351_v34 = vld [vmem:[#allocation3 + $0x1b0] sm:$0xff] }
 0x1f2   :  { %594 = vmatprep.subr.bf16.mxu0 %v312_v10 }
 0x1f5   :  { %595 = vmatpush1.bf16.msra.mxu0 %v311_v11 }
 0x1f6   :  { %596 = vmatprep.subr.bf16.mxu0 %v320_v12 }
 0x1f9   :  { %597 = vmatpush1.bf16.msra.mxu0 %v319_v13 }
 0x1fa   :  { %598 = vmatprep.subr.bf16.mxu0 %v328_v14  ;;  %v455_v14 = vsub.s32 6, %v1788_v20 }
 0x1fd   :  { %599 = vmatpush1.bf16.msra.mxu0 %v327_v15  ;;  %v459_v15 = vsub.s32 7, %v1788_v20 }
 0x1fe   :  { %600 = vmatprep.subr.bf16.mxu0 %v336_v16  ;;  %v456_v16 = vrot.slane %v425_v44, %v455_v14 }
 0x201   :  { %601 = vmatpush1.bf16.msra.mxu0 %v335_v17  ;;  %v460_v17 = vrot.slane %v425_v44, %v459_v15 }
 0x202   :  { %602 = vmatprep.subr.bf16.mxu0 %v344_v18 }
 0x205   :  { %603 = vmatpush1.bf16.msra.mxu0 %v343_v19 }
 0x206   :  { %604 = vmatprep.subr.bf16.mxu0 %v352_v22 }
 0x209   :  { %605 = vmatpush1.bf16.msra.mxu0 %v351_v34 }
 0x20a   :  { %606 = vmatprep.subr.bf16.mxu0 %v360_v24 }
 0x20d   :  { %607 = vmatpush1.bf16.msra.mxu0 %v359_v25 }
 0x20e   :  { %608 = vmatprep.subr.bf16.mxu0 %v368_v26 }
 0x211   :  { %609 = vmatpush1.bf16.msra.mxu0 %v367_v28 }
 0x212   :  { %610 = vmatprep.subr.bf16.mxu0 %v376_v29 }
 0x215   :  { %611 = vmatpush1.bf16.msra.mxu0 %v375_v32 }
 0x216   :  { %612 = vmatprep.subr.bf16.mxu0 %v384_v33 }
 0x219   :  { %613 = vmatpush1.bf16.msra.mxu0 %v383_v35 }
 0x21a   :  { %614 = vmatprep.subr.bf16.mxu0 %v392_v36 }
 0x21d   :  { %615 = vmatpush1.bf16.msra.mxu0 %v391_v37 }
 0x21e   :  { %616 = vmatprep.subr.bf16.mxu0 %v400_v38 }
 0x221   :  { %617 = vmatpush1.bf16.msra.mxu0 %v399_v27 }
 0x222   :  { %618 = vmatprep.subr.bf16.mxu0 %v408_v31 }
 0x225   :  { %619 = vmatpush1.bf16.msra.mxu0 %v407_v39 }
 0x226   :  { %620 = vmatprep.subr.bf16.mxu0 %v416_v40 }
 0x229   :  { %621 = vmatpush1.bf16.msra.mxu0 %v415_v41 }
 0x22a   :  { %622 = vmatprep.subr.bf16.mxu0 %v424_v42 }
 0x22d   :  { %623 = vmatpush1.bf16.msra.mxu0 %v423_v43 }
 0x230   :  { %625 = vmatmul.mubr.bf16.vlgmr.msra.gmra.mrb[12].mxu0 %v1811_v30  ;;  %v448_v30 = vrot.slane %v425_v44, %v447_v55 }
 0x283   :  { %v503_v47 = vpop.f32.mrb[4].mxu0 }
 0x284   :  { %v1821_v48 = vadd.f32 %v503_v47, %v432_v45  ;;  %v505_v49 = vpop.f32.mrb[5].mxu0 }
 0x285   :  { %v506_v50 = vadd.f32 %v505_v49, %v436_v46  ;;  %v507_v51 = vpop.f32.mrb[6].mxu0 }
 0x286   :  { %v633_v52 = vmax.f32 %v1821_v48, 0.0  ;;  %v508_v53 = vpop.f32.mrb[7].mxu0 }
 0x287   :  { %v634_v54 = vmax.f32 %v506_v50, 0.0 }
 0x289   :  { %v585_v58 = vpop.f32.mrb[0].mxu1 }
 0x28a   :  { %v1826_v59 = vadd.f32 %v585_v58, %v448_v30  ;;  %v587_v60 = vpop.f32.mrb[1].mxu1 }
 0x28b   :  { %v1828_v61 = vadd.f32 %v587_v60, %v452_v57  ;;  %v589_v62 = vpop.f32.mrb[2].mxu1 }
 0x28c   :  { %v637_v63 = vmax.f32 %v1826_v59, 0.0  ;;  %v590_v0 = vpop.f32.mrb[3].mxu1 }
 0x28d   :  { %v638_v1 = vmax.f32 %v1828_v61, 0.0 }
 0x2c3   :  { %v544_v6 = vpop.f32.mrb[8].mxu0 }
 0x2c4   :  { %v1834_v7 = vadd.f32 %v544_v6, %v440_v4  ;;  %v546_v8 = vpop.f32.mrb[9].mxu0 }
 0x2c5   :  { %v1836_v9 = vadd.f32 %v546_v8, %v444_v5  ;;  %v548_v10 = vpop.f32.mrb[10].mxu0 }
 0x2c6   :  { %v635_v11 = vmax.f32 %v1834_v7, 0.0  ;;  %v549_v12 = vpop.f32.mrb[11].mxu0 }
 0x2c7   :  { %v636_v13 = vmax.f32 %v1836_v9, 0.0 }
 0x303   :  { %v626_v18 = vpop.f32.mrb[12].mxu0 }
 0x304   :  { %v1842_v19 = vadd.f32 %v626_v18, %v456_v16  ;;  %v628_v22 = vpop.f32.mrb[13].mxu0 }
 0x305   :  { %v1844_v34 = vadd.f32 %v628_v22, %v460_v17  ;;  %v630_v24 = vpop.f32.mrb[14].mxu0 }
 0x306   :  { %v639_v25 = vmax.f32 %v1842_v19, 0.0  ;;  %v631_v26 = vpop.f32.mrb[15].mxu0 }
 0x307   :  { %v640_v28 = vmax.f32 %v1844_v34, 0.0 }
 0x308   :  { %1598 = dma.done.wait [#allocation6 + $0x2], 16384 }
 0x309   :  { %1599 = vsyncadd [#allocation6 + $0x2], 4294950912  ;;  %v775_v29 = vpack.c.bf16 %v634_v54, %v634_v54  ;;  %v646_v32 = vld [vmem:[#allocation4 + $0x8] sm:$0xff]  ;;  %v645_v20 = vld [vmem:[#allocation4] sm:$0xff]  ;;  %v774_v4 = vpack.c.bf16 %v633_v52, %v633_v52  ;;  %v777_v5 = vpack.c.bf16 %v636_v13, %v636_v13 }
 0x30a   :  { %v648_v33 = vld [vmem:[#allocation4 + $0x18] sm:$0xff]  ;;  %793 = vmatprep.subr.bf16.mxu1 %v646_v32  ;;  %v647_v35 = vld [vmem:[#allocation4 + $0x10] sm:$0xff]  ;;  %v650_v36 = vld [vmem:[#allocation4 + $0x28] sm:$0xff] }
 0x30b   :  { %825 = vmatprep.mubr.bf16.mxu1 %v775_v29  ;;  %794 = vmatpush1.bf16.msra.mxu1 %v645_v20  ;;  %v649_v37 = vld [vmem:[#allocation4 + $0x20] sm:$0xff]  ;;  %v652_v38 = vld [vmem:[#allocation4 + $0x38] sm:$0xff]  ;;  %v651_v27 = vld [vmem:[#allocation4 + $0x30] sm:$0xff] }
 0x30c   :  { %795 = vmatprep.subr.bf16.mxu1 %v648_v33  ;;  %v654_v31 = vld [vmem:[#allocation4 + $0x48] sm:$0xff]  ;;  %v653_v39 = vld [vmem:[#allocation4 + $0x40] sm:$0xff]  ;;  %v656_v40 = vld [vmem:[#allocation4 + $0x58] sm:$0xff] }
 0x30d   :  { %v655_v41 = vld [vmem:[#allocation4 + $0x50] sm:$0xff]  ;;  %v658_v42 = vld [vmem:[#allocation4 + $0x68] sm:$0xff]  ;;  %v657_v43 = vld [vmem:[#allocation4 + $0x60] sm:$0xff] }
 0x30e   :  { %v660_v44 = vld [vmem:[#allocation4 + $0x78] sm:$0xff]  ;;  %v659_v45 = vld [vmem:[#allocation4 + $0x70] sm:$0xff]  ;;  %v662_v46 = vld [vmem:[#allocation4 + $0x88] sm:$0xff] }
 0x30f   :  { %796 = vmatpush1.bf16.msra.mxu1 %v647_v35  ;;  %v661_v47 = vld [vmem:[#allocation4 + $0x80] sm:$0xff]  ;;  %v664_v49 = vld [vmem:[#allocation4 + $0x98] sm:$0xff]  ;;  %v663_v50 = vld [vmem:[#allocation4 + $0x90] sm:$0xff] }
 0x310   :  { %797 = vmatprep.subr.bf16.mxu1 %v650_v36  ;;  %v666_v51 = vld [vmem:[#allocation4 + $0xa8] sm:$0xff]  ;;  %v665_v53 = vld [vmem:[#allocation4 + $0xa0] sm:$0xff]  ;;  %v668_v54 = vld [vmem:[#allocation4 + $0xb8] sm:$0xff] }
 0x311   :  { %v667_v55 = vld [vmem:[#allocation4 + $0xb0] sm:$0xff]  ;;  %v670_v56 = vld [vmem:[#allocation4 + $0xc8] sm:$0xff]  ;;  %v669_v30 = vld [vmem:[#allocation4 + $0xc0] sm:$0xff] }
 0x312   :  { %v672_v57 = vld [vmem:[#allocation4 + $0xd8] sm:$0xff]  ;;  %v671_v58 = vld [vmem:[#allocation4 + $0xd0] sm:$0xff]  ;;  %v674_v60 = vld [vmem:[#allocation4 + $0xe8] sm:$0xff] }
 0x313   :  { %798 = vmatpush1.bf16.msra.mxu1 %v649_v37  ;;  %v673_v62 = vld [vmem:[#allocation4 + $0xe0] sm:$0xff]  ;;  %v676_v0 = vld [vmem:[#allocation4 + $0xf8] sm:$0xff]  ;;  %v675_v2 = vld [vmem:[#allocation4 + $0xf0] sm:$0xff] }
 0x314   :  { %799 = vmatprep.subr.bf16.mxu1 %v652_v38  ;;  %v678_v3 = vld [vmem:[#allocation4 + $0x108] sm:$0xff]  ;;  %v677_v6 = vld [vmem:[#allocation4 + $0x100] sm:$0xff]  ;;  %v680_v8 = vld [vmem:[#allocation4 + $0x118] sm:$0xff] }
 0x315   :  { %v679_v10 = vld [vmem:[#allocation4 + $0x110] sm:$0xff]  ;;  %v682_v12 = vld [vmem:[#allocation4 + $0x128] sm:$0xff]  ;;  %v681_v14 = vld [vmem:[#allocation4 + $0x120] sm:$0xff] }
 0x316   :  { %v684_v48 = vld [vmem:[#allocation4 + $0x138] sm:$0xff]  ;;  %v683_v52 = vld [vmem:[#allocation4 + $0x130] sm:$0xff]  ;;  %v686_v15 = vld [vmem:[#allocation4 + $0x148] sm:$0xff] }
 0x317   :  { %800 = vmatpush1.bf16.msra.mxu1 %v651_v27  ;;  %v685_v9 = vld [vmem:[#allocation4 + $0x140] sm:$0xff]  ;;  %v688_v13 = vld [vmem:[#allocation4 + $0x158] sm:$0xff]  ;;  %v687_v16 = vld [vmem:[#allocation4 + $0x150] sm:$0xff] }
 0x318   :  { %801 = vmatprep.subr.bf16.mxu1 %v654_v31  ;;  %v690_v17 = vld [vmem:[#allocation4 + $0x168] sm:$0xff]  ;;  %v689_v18 = vld [vmem:[#allocation4 + $0x160] sm:$0xff]  ;;  %v692_v22 = vld [vmem:[#allocation4 + $0x178] sm:$0xff] }
 0x319   :  { %v691_v24 = vld [vmem:[#allocation4 + $0x170] sm:$0xff]  ;;  %v694_v26 = vld [vmem:[#allocation4 + $0x188] sm:$0xff]  ;;  %v693_v29 = vld [vmem:[#allocation4 + $0x180] sm:$0xff] }
 0x31a   :  { %v696_v32 = vld [vmem:[#allocation4 + $0x198] sm:$0xff]  ;;  %v695_v20 = vld [vmem:[#allocation4 + $0x190] sm:$0xff]  ;;  %v698_v33 = vld [vmem:[#allocation4 + $0x1a8] sm:$0xff] }
 0x31b   :  { %802 = vmatpush1.bf16.msra.mxu1 %v653_v39  ;;  %v697_v35 = vld [vmem:[#allocation4 + $0x1a0] sm:$0xff]  ;;  %v700_v36 = vld [vmem:[#allocation4 + $0x1b8] sm:$0xff]  ;;  %v699_v37 = vld [vmem:[#allocation4 + $0x1b0] sm:$0xff] }
 0x31c   :  { %803 = vmatprep.subr.bf16.mxu1 %v656_v40  ;;  %v702_v38 = vld [vmem:[#allocation4 + $0x1c8] sm:$0xff]  ;;  %v701_v27 = vld [vmem:[#allocation4 + $0x1c0] sm:$0xff]  ;;  %v704_v31 = vld [vmem:[#allocation4 + $0x1d8] sm:$0xff] }
 0x31d   :  { %v703_v39 = vld [vmem:[#allocation4 + $0x1d0] sm:$0xff]  ;;  %v706_v40 = vld [vmem:[#allocation4 + $0x1e8] sm:$0xff]  ;;  %v716_v7 = vld [vmem:[#allocation4 + $0x238] sm:$0xff] }
 0x31e   :  { %v717_v61 = vld [vmem:[#allocation4 + $0x240] sm:$0xff]  ;;  %v748_v59 = vld [vmem:[#allocation4 + $0x338] sm:$0xff] }
 0x31f   :  { %804 = vmatpush1.bf16.msra.mxu1 %v655_v41  ;;  %v705_v41 = vld [vmem:[#allocation4 + $0x1e0] sm:$0xff] }
 0x320   :  { %805 = vmatprep.subr.bf16.mxu1 %v658_v42  ;;  %v708_v42 = vld [vmem:[#allocation4 + $0x1f8] sm:$0xff]  ;;  %v749_v34 = vld [vmem:[#allocation4 + $0x340] sm:$0xff] }
 0x323   :  { %806 = vmatpush1.bf16.msra.mxu1 %v657_v43  ;;  %v707_v43 = vld [vmem:[#allocation4 + $0x1f0] sm:$0xff] }
 0x324   :  { %807 = vmatprep.subr.bf16.mxu1 %v660_v44  ;;  %v710_v44 = vld [vmem:[#allocation4 + $0x208] sm:$0xff] }
 0x327   :  { %808 = vmatpush1.bf16.msra.mxu1 %v659_v45  ;;  %v776_v45 = vpack.c.bf16 %v635_v11, %v635_v11  ;;  %v715_v11 = vld [vmem:[#allocation4 + $0x230] sm:$0xff] }
 0x328   :  { %809 = vmatprep.subr.bf16.mxu1 %v662_v46  ;;  %v779_v46 = vpack.c.bf16 %v638_v1, %v638_v1  ;;  %v720_v1 = vld [vmem:[#allocation4 + $0x258] sm:$0xff] }
 0x32b   :  { %810 = vmatpush1.bf16.msra.mxu1 %v661_v47  ;;  %v709_v47 = vld [vmem:[#allocation4 + $0x200] sm:$0xff] }
 0x32c   :  { %811 = vmatprep.subr.bf16.mxu1 %v664_v49  ;;  %v712_v49 = vld [vmem:[#allocation4 + $0x218] sm:$0xff] }
 0x32f   :  { %812 = vmatpush1.bf16.msra.mxu1 %v663_v50  ;;  %v711_v50 = vld [vmem:[#allocation4 + $0x210] sm:$0xff] }
 0x330   :  { %813 = vmatprep.subr.bf16.mxu1 %v666_v51  ;;  %v714_v51 = vld [vmem:[#allocation4 + $0x228] sm:$0xff] }
 0x333   :  { %814 = vmatpush1.bf16.msra.mxu1 %v665_v53  ;;  %v713_v53 = vld [vmem:[#allocation4 + $0x220] sm:$0xff] }
 0x334   :  { %815 = vmatprep.subr.bf16.mxu1 %v668_v54  ;;  %v718_v54 = vld [vmem:[#allocation4 + $0x248] sm:$0xff] }
 0x337   :  { %816 = vmatpush1.bf16.msra.mxu1 %v667_v55  ;;  %v719_v55 = vld [vmem:[#allocation4 + $0x250] sm:$0xff] }
 0x338   :  { %817 = vmatprep.subr.bf16.mxu1 %v670_v56  ;;  %v722_v56 = vld [vmem:[#allocation4 + $0x268] sm:$0xff] }
 0x33b   :  { %818 = vmatpush1.bf16.msra.mxu1 %v669_v30  ;;  %v721_v30 = vld [vmem:[#allocation4 + $0x260] sm:$0xff] }
 0x33c   :  { %819 = vmatprep.subr.bf16.mxu1 %v672_v57  ;;  %v724_v57 = vld [vmem:[#allocation4 + $0x278] sm:$0xff] }
 0x33f   :  { %820 = vmatpush1.bf16.msra.mxu1 %v671_v58  ;;  %v723_v58 = vld [vmem:[#allocation4 + $0x270] sm:$0xff] }
 0x340   :  { %821 = vmatprep.subr.bf16.mxu1 %v674_v60  ;;  %v726_v60 = vld [vmem:[#allocation4 + $0x288] sm:$0xff] }
 0x343   :  { %822 = vmatpush1.bf16.msra.mxu1 %v673_v62  ;;  %v725_v62 = vld [vmem:[#allocation4 + $0x280] sm:$0xff] }
 0x344   :  { %823 = vmatprep.subr.bf16.mxu1 %v676_v0  ;;  %v728_v0 = vld [vmem:[#allocation4 + $0x298] sm:$0xff] }
 0x347   :  { %824 = vmatpush1.bf16.msra.mxu1 %v675_v2  ;;  %v727_v2 = vld [vmem:[#allocation4 + $0x290] sm:$0xff] }
 0x348   :  { %834 = vmatprep.subr.bf16.mxu1 %v678_v3  ;;  %v730_v3 = vld [vmem:[#allocation4 + $0x2a8] sm:$0xff] }
 0x34a   :  { %826 = vmatmul.mubr.bf16.vlgmr.msra.gmra.mrb[4].mxu1 %v774_v4  ;;  %v729_v4 = vld [vmem:[#allocation4 + $0x2a0] sm:$0xff] }
 0x34b   :  { %835 = vmatpush1.bf16.msra.mxu1 %v677_v6  ;;  %866 = vmatprep.mubr.bf16.mxu1 %v777_v5  ;;  %v732_v5 = vld [vmem:[#allocation4 + $0x2b8] sm:$0xff]  ;;  %v731_v6 = vld [vmem:[#allocation4 + $0x2b0] sm:$0xff] }
 0x34c   :  { %836 = vmatprep.subr.bf16.mxu1 %v680_v8  ;;  %v734_v8 = vld [vmem:[#allocation4 + $0x2c8] sm:$0xff] }
 0x34f   :  { %837 = vmatpush1.bf16.msra.mxu1 %v679_v10  ;;  %v733_v10 = vld [vmem:[#allocation4 + $0x2c0] sm:$0xff] }
 0x350   :  { %838 = vmatprep.subr.bf16.mxu1 %v682_v12  ;;  %v736_v12 = vld [vmem:[#allocation4 + $0x2d8] sm:$0xff] }
 0x353   :  { %839 = vmatpush1.bf16.msra.mxu1 %v681_v14  ;;  %v735_v14 = vld [vmem:[#allocation4 + $0x2d0] sm:$0xff] }
 0x354   :  { %840 = vmatprep.subr.bf16.mxu1 %v684_v48  ;;  %v738_v48 = vld [vmem:[#allocation4 + $0x2e8] sm:$0xff] }
 0x357   :  { %841 = vmatpush1.bf16.msra.mxu1 %v683_v52  ;;  %v737_v52 = vld [vmem:[#allocation4 + $0x2e0] sm:$0xff] }
 0x358   :  { %842 = vmatprep.subr.bf16.mxu1 %v686_v15  ;;  %v740_v15 = vld [vmem:[#allocation4 + $0x2f8] sm:$0xff] }
 0x35b   :  { %843 = vmatpush1.bf16.msra.mxu1 %v685_v9  ;;  %v739_v9 = vld [vmem:[#allocation4 + $0x2f0] sm:$0xff] }
 0x35c   :  { %844 = vmatprep.subr.bf16.mxu1 %v688_v13  ;;  %v742_v13 = vld [vmem:[#allocation4 + $0x308] sm:$0xff] }
 0x35f   :  { %845 = vmatpush1.bf16.msra.mxu1 %v687_v16  ;;  %v778_v16 = vpack.c.bf16 %v637_v63, %v637_v63  ;;  %v747_v63 = vld [vmem:[#allocation4 + $0x330] sm:$0xff] }
 0x360   :  { %846 = vmatprep.subr.bf16.mxu1 %v690_v17  ;;  %v781_v17 = vpack.c.bf16 %v640_v28, %v640_v28  ;;  %v752_v28 = vld [vmem:[#allocation4 + $0x358] sm:$0xff] }
 0x363   :  { %847 = vmatpush1.bf16.msra.mxu1 %v689_v18  ;;  %v741_v18 = vld [vmem:[#allocation4 + $0x300] sm:$0xff] }
 0x364   :  { %848 = vmatprep.subr.bf16.mxu1 %v692_v22  ;;  %v744_v22 = vld [vmem:[#allocation4 + $0x318] sm:$0xff] }
 0x367   :  { %849 = vmatpush1.bf16.msra.mxu1 %v691_v24  ;;  %v743_v24 = vld [vmem:[#allocation4 + $0x310] sm:$0xff] }
 0x368   :  { %850 = vmatprep.subr.bf16.mxu1 %v694_v26  ;;  %v746_v26 = vld [vmem:[#allocation4 + $0x328] sm:$0xff] }
 0x36b   :  { %851 = vmatpush1.bf16.msra.mxu1 %v693_v29  ;;  %v745_v29 = vld [vmem:[#allocation4 + $0x320] sm:$0xff] }
 0x36c   :  { %852 = vmatprep.subr.bf16.mxu1 %v696_v32  ;;  %v750_v32 = vld [vmem:[#allocation4 + $0x348] sm:$0xff] }
 0x36f   :  { %853 = vmatpush1.bf16.msra.mxu1 %v695_v20  ;;  %v751_v20 = vld [vmem:[#allocation4 + $0x350] sm:$0xff] }
 0x370   :  { %854 = vmatprep.subr.bf16.mxu1 %v698_v33  ;;  %v754_v33 = vld [vmem:[#allocation4 + $0x368] sm:$0xff] }
 0x373   :  { %855 = vmatpush1.bf16.msra.mxu1 %v697_v35  ;;  %v753_v35 = vld [vmem:[#allocation4 + $0x360] sm:$0xff] }
 0x374   :  { %856 = vmatprep.subr.bf16.mxu1 %v700_v36  ;;  %v756_v36 = vld [vmem:[#allocation4 + $0x378] sm:$0xff] }
 0x377   :  { %857 = vmatpush1.bf16.msra.mxu1 %v699_v37  ;;  %v755_v37 = vld [vmem:[#allocation4 + $0x370] sm:$0xff] }
 0x378   :  { %858 = vmatprep.subr.bf16.mxu1 %v702_v38  ;;  %v758_v38 = vld [vmem:[#allocation4 + $0x388] sm:$0xff] }
 0x37b   :  { %859 = vmatpush1.bf16.msra.mxu1 %v701_v27  ;;  %v757_v27 = vld [vmem:[#allocation4 + $0x380] sm:$0xff] }
 0x37c   :  { %860 = vmatprep.subr.bf16.mxu1 %v704_v31  ;;  %v760_v31 = vld [vmem:[#allocation4 + $0x398] sm:$0xff] }
 0x37f   :  { %861 = vmatpush1.bf16.msra.mxu1 %v703_v39  ;;  %v759_v39 = vld [vmem:[#allocation4 + $0x390] sm:$0xff] }
 0x380   :  { %862 = vmatprep.subr.bf16.mxu1 %v706_v40  ;;  %v762_v40 = vld [vmem:[#allocation4 + $0x3a8] sm:$0xff] }
 0x383   :  { %863 = vmatpush1.bf16.msra.mxu1 %v705_v41  ;;  %v761_v41 = vld [vmem:[#allocation4 + $0x3a0] sm:$0xff] }
 0x384   :  { %864 = vmatprep.subr.bf16.mxu1 %v708_v42  ;;  %v764_v42 = vld [vmem:[#allocation4 + $0x3b8] sm:$0xff] }
 0x387   :  { %865 = vmatpush1.bf16.msra.mxu1 %v707_v43  ;;  %v763_v43 = vld [vmem:[#allocation4 + $0x3b0] sm:$0xff] }
 0x388   :  { %875 = vmatprep.subr.bf16.mxu1 %v710_v44  ;;  %v766_v44 = vld [vmem:[#allocation4 + $0x3c8] sm:$0xff] }
 0x38a   :  { %867 = vmatmul.mubr.bf16.vlgmr.msra.gmra.mrb[4].mxu1 %v776_v45  ;;  %v765_v45 = vld [vmem:[#allocation4 + $0x3c0] sm:$0xff] }
 0x38b   :  { %876 = vmatpush1.bf16.msra.mxu1 %v709_v47  ;;  %907 = vmatprep.mubr.bf16.mxu1 %v779_v46  ;;  %v768_v46 = vld [vmem:[#allocation4 + $0x3d8] sm:$0xff]  ;;  %v767_v47 = vld [vmem:[#allocation4 + $0x3d0] sm:$0xff] }
 0x38c   :  { %877 = vmatprep.subr.bf16.mxu1 %v712_v49  ;;  %v770_v49 = vld [vmem:[#allocation4 + $0x3e8] sm:$0xff] }
 0x38f   :  { %878 = vmatpush1.bf16.msra.mxu1 %v711_v50  ;;  %v769_v50 = vld [vmem:[#allocation4 + $0x3e0] sm:$0xff] }
 0x390   :  { %879 = vmatprep.subr.bf16.mxu1 %v714_v51  ;;  %v772_v51 = vld [vmem:[#allocation4 + $0x3f8] sm:$0xff] }
 0x393   :  { %880 = vmatpush1.bf16.msra.mxu1 %v713_v53  ;;  %v771_v53 = vld [vmem:[#allocation4 + $0x3f0] sm:$0xff] }
 0x394   :  { %881 = vmatprep.subr.bf16.mxu1 %v716_v7  ;;  %v780_v7 = vpack.c.bf16 %v639_v25, %v639_v25 }
 0x397   :  { %882 = vmatpush1.bf16.msra.mxu1 %v715_v11  ;;  %v773_v11 = vld [vmem:[#allocation14] sm:$0x3] }
 0x398   :  { %883 = vmatprep.subr.bf16.mxu1 %v718_v54  ;;  %v786_v54 = vrot.slane %v773_v11, %v1791_v21 }
 0x39b   :  { %884 = vmatpush1.bf16.msra.mxu1 %v717_v61  ;;  %v790_v61 = vrot.slane %v773_v11, %v1797_v23 }
 0x39c   :  { %885 = vmatprep.subr.bf16.mxu1 %v720_v1 }
 0x39f   :  { %886 = vmatpush1.bf16.msra.mxu1 %v719_v55 }
 0x3a0   :  { %887 = vmatprep.subr.bf16.mxu1 %v722_v56 }
 0x3a3   :  { %888 = vmatpush1.bf16.msra.mxu1 %v721_v30 }
 0x3a4   :  { %889 = vmatprep.subr.bf16.mxu1 %v724_v57 }
 0x3a7   :  { %890 = vmatpush1.bf16.msra.mxu1 %v723_v58 }
 0x3a8   :  { %891 = vmatprep.subr.bf16.mxu1 %v726_v60 }
 0x3ab   :  { %892 = vmatpush1.bf16.msra.mxu1 %v725_v62 }
 0x3ac   :  { %893 = vmatprep.subr.bf16.mxu1 %v728_v0 }
 0x3af   :  { %894 = vmatpush1.bf16.msra.mxu1 %v727_v2 }
 0x3b0   :  { %895 = vmatprep.subr.bf16.mxu1 %v730_v3 }
 0x3b3   :  { %896 = vmatpush1.bf16.msra.mxu1 %v729_v4 }
 0x3b4   :  { %897 = vmatprep.subr.bf16.mxu1 %v732_v5 }
 0x3b7   :  { %898 = vmatpush1.bf16.msra.mxu1 %v731_v6 }
 0x3b8   :  { %899 = vmatprep.subr.bf16.mxu1 %v734_v8 }
 0x3bb   :  { %900 = vmatpush1.bf16.msra.mxu1 %v733_v10 }
 0x3bc   :  { %901 = vmatprep.subr.bf16.mxu1 %v736_v12 }
 0x3bf   :  { %902 = vmatpush1.bf16.msra.mxu1 %v735_v14 }
 0x3c0   :  { %903 = vmatprep.subr.bf16.mxu1 %v738_v48 }
 0x3c3   :  { %904 = vmatpush1.bf16.msra.mxu1 %v737_v52 }
 0x3c4   :  { %905 = vmatprep.subr.bf16.mxu1 %v740_v15 }
 0x3c7   :  { %906 = vmatpush1.bf16.msra.mxu1 %v739_v9 }
 0x3c8   :  { %916 = vmatprep.subr.bf16.mxu1 %v742_v13 }
 0x3ca   :  { %908 = vmatmul.mubr.bf16.vlgmr.msra.gmra.mrb[4].mxu1 %v778_v16 }
 0x3cb   :  { %917 = vmatpush1.bf16.msra.mxu1 %v741_v18  ;;  %948 = vmatprep.mubr.bf16.mxu1 %v781_v17 }
 0x3cc   :  { %918 = vmatprep.subr.bf16.mxu1 %v744_v22 }
 0x3cf   :  { %919 = vmatpush1.bf16.msra.mxu1 %v743_v24 }
 0x3d0   :  { %920 = vmatprep.subr.bf16.mxu1 %v746_v26 }
 0x3d3   :  { %921 = vmatpush1.bf16.msra.mxu1 %v745_v29 }
 0x3d4   :  { %922 = vmatprep.subr.bf16.mxu1 %v748_v59 }
 0x3d7   :  { %923 = vmatpush1.bf16.msra.mxu1 %v747_v63 }
 0x3d8   :  { %924 = vmatprep.subr.bf16.mxu1 %v750_v32 }
 0x3db   :  { %925 = vmatpush1.bf16.msra.mxu1 %v749_v34 }
 0x3dc   :  { %926 = vmatprep.subr.bf16.mxu1 %v752_v28 }
 0x3df   :  { %927 = vmatpush1.bf16.msra.mxu1 %v751_v20 }
 0x3e0   :  { %928 = vmatprep.subr.bf16.mxu1 %v754_v33 }
 0x3e3   :  { %929 = vmatpush1.bf16.msra.mxu1 %v753_v35 }
 0x3e4   :  { %930 = vmatprep.subr.bf16.mxu1 %v756_v36 }
 0x3e7   :  { %931 = vmatpush1.bf16.msra.mxu1 %v755_v37 }
 0x3e8   :  { %932 = vmatprep.subr.bf16.mxu1 %v758_v38 }
 0x3eb   :  { %933 = vmatpush1.bf16.msra.mxu1 %v757_v27 }
 0x3ec   :  { %934 = vmatprep.subr.bf16.mxu1 %v760_v31 }
 0x3ef   :  { %935 = vmatpush1.bf16.msra.mxu1 %v759_v39 }
 0x3f0   :  { %936 = vmatprep.subr.bf16.mxu1 %v762_v40 }
 0x3f3   :  { %937 = vmatpush1.bf16.msra.mxu1 %v761_v41 }
 0x3f4   :  { %938 = vmatprep.subr.bf16.mxu1 %v764_v42 }
 0x3f7   :  { %939 = vmatpush1.bf16.msra.mxu1 %v763_v43 }
 0x3f8   :  { %940 = vmatprep.subr.bf16.mxu1 %v766_v44 }
 0x3fb   :  { %941 = vmatpush1.bf16.msra.mxu1 %v765_v45 }
 0x3fc   :  { %942 = vmatprep.subr.bf16.mxu1 %v768_v46 }
 0x3ff   :  { %943 = vmatpush1.bf16.msra.mxu1 %v767_v47 }
 0x400   :  { %944 = vmatprep.subr.bf16.mxu1 %v770_v49 }
 0x403   :  { %945 = vmatpush1.bf16.msra.mxu1 %v769_v50 }
 0x404   :  { %946 = vmatprep.subr.bf16.mxu1 %v772_v51 }
 0x407   :  { %947 = vmatpush1.bf16.msra.mxu1 %v771_v53 }
 0x40a   :  { %949 = vmatmul.mubr.bf16.vlgmr.msra.gmra.mrb[4].mxu1 %v780_v7 }
 0x4dd   :  { %v950_v1 = vpop.f32.mrb[4].mxu1 }
 0x4de   :  { %v1871_v55 = vadd.f32 %v950_v1, %v786_v54  ;;  %v952_v56 = vpop.f32.mrb[5].mxu1 }
 0x4df   :  { %v1435_v30 = vadd.f32 %v952_v56, %v790_v61  ;;  %v954_v57 = vpop.f32.mrb[6].mxu1 }
 0x4e0   :  { %v957_v58 = vmax.f32 %v1871_v55, 0.0  ;;  %v955_v60 = vpop.f32.mrb[7].mxu1 }
 0x4e1   :  { %v958_v62 = vmax.f32 %v1435_v30, 0.0 }
 0x4e2   :  { %1600 = dma.done.wait [#allocation6 + $0x3], 4096 }
 0x4e3   :  { %1601 = vsyncadd [#allocation6 + $0x3], 4294963200  ;;  %v996_v19 = vpack.c.bf16 %v958_v62, %v958_v62  ;;  %v963_v25 = vld [vmem:[#allocation5 + $0x8] sm:$0xff]  ;;  %v962_v0 = vld [vmem:[#allocation5] sm:$0xff]  ;;  %v995_v37 = vpack.c.bf16 %v957_v58, %v957_v58  ;;  %vm1051_vm0 = vcmask 254976   ;;  %s1629_s1 = smov 32  }
 0x4e4   :  { %v965_v2 = vld [vmem:[#allocation5 + $0x18] sm:$0xff]  ;;  %1008 = vmatprep.subr.bf16.mxu0 %v963_v25  ;;  %v964_v3 = vld [vmem:[#allocation5 + $0x10] sm:$0xff]  ;;  %v967_v4 = vld [vmem:[#allocation5 + $0x28] sm:$0xff]  ;;  %vm1086_vm1 = vcmask 261120   ;;  %vm1632_vm2 = vmmov 0   ;;  %vm1328_vm3 = vcmask 64512  }
 0x4e5   :  { %1040 = vmatprep.mubr.bf16.mxu0 %v996_v19  ;;  %1009 = vmatpush1.bf16.msra.mxu0 %v962_v0  ;;  %v966_v5 = vld [vmem:[#allocation5 + $0x20] sm:$0xff]  ;;  %v969_v6 = vld [vmem:[#allocation5 + $0x38] sm:$0xff]  ;;  %v968_v8 = vld [vmem:[#allocation5 + $0x30] sm:$0xff] }
 0x4e6   :  { %1010 = vmatprep.subr.bf16.mxu0 %v965_v2  ;;  %v971_v10 = vld [vmem:[#allocation5 + $0x48] sm:$0xff]  ;;  %v970_v12 = vld [vmem:[#allocation5 + $0x40] sm:$0xff]  ;;  %v973_v14 = vld [vmem:[#allocation5 + $0x58] sm:$0xff] }
 0x4e7   :  { %v972_v48 = vld [vmem:[#allocation5 + $0x50] sm:$0xff]  ;;  %v975_v52 = vld [vmem:[#allocation5 + $0x68] sm:$0xff]  ;;  %v974_v15 = vld [vmem:[#allocation5 + $0x60] sm:$0xff] }
 0x4e8   :  { %v977_v9 = vld [vmem:[#allocation5 + $0x78] sm:$0xff]  ;;  %v976_v13 = vld [vmem:[#allocation5 + $0x70] sm:$0xff]  ;;  %v979_v16 = vld [vmem:[#allocation5 + $0x88] sm:$0xff] }
 0x4e9   :  { %1011 = vmatpush1.bf16.msra.mxu0 %v964_v3  ;;  %v978_v17 = vld [vmem:[#allocation5 + $0x80] sm:$0xff]  ;;  %v981_v18 = vld [vmem:[#allocation5 + $0x98] sm:$0xff]  ;;  %v980_v22 = vld [vmem:[#allocation5 + $0x90] sm:$0xff] }
 0x4ea   :  { %1012 = vmatprep.subr.bf16.mxu0 %v967_v4  ;;  %v983_v24 = vld [vmem:[#allocation5 + $0xa8] sm:$0xff]  ;;  %v982_v26 = vld [vmem:[#allocation5 + $0xa0] sm:$0xff]  ;;  %v985_v29 = vld [vmem:[#allocation5 + $0xb8] sm:$0xff] }
 0x4eb   :  { %v984_v59 = vld [vmem:[#allocation5 + $0xb0] sm:$0xff]  ;;  %v987_v63 = vld [vmem:[#allocation5 + $0xc8] sm:$0xff]  ;;  %v986_v32 = vld [vmem:[#allocation5 + $0xc0] sm:$0xff] }
 0x4ec   :  { %v989_v34 = vld [vmem:[#allocation5 + $0xd8] sm:$0xff]  ;;  %v988_v28 = vld [vmem:[#allocation5 + $0xd0] sm:$0xff]  ;;  %v991_v20 = vld [vmem:[#allocation5 + $0xe8] sm:$0xff] }
 0x4ed   :  { %1013 = vmatpush1.bf16.msra.mxu0 %v966_v5  ;;  %v990_v33 = vld [vmem:[#allocation5 + $0xe0] sm:$0xff]  ;;  %v993_v35 = vld [vmem:[#allocation5 + $0xf8] sm:$0xff]  ;;  %v992_v36 = vld [vmem:[#allocation5 + $0xf0] sm:$0xff] }
 0x4ee   :  { %1014 = vmatprep.subr.bf16.mxu0 %v969_v6  ;;  %v1080_v38 = vld [vmem:[%s1933_s9] sm:$0xff]  ;;  %v1081_v27 = vld [vmem:[%s1933_s9 + $0x8] sm:$0xff]  ;;  %v1082_v40 = vld [vmem:[%s1933_s9 + $0x10] sm:$0xff] }
 0x4ef   :  { %v1426_v31 = vpack.c.bf16 %v1081_v27, %v1080_v38  ;;  %v994_v39 = vld [vmem:[#allocation15] sm:$0x3]  ;;  %v1083_v41 = vld [vmem:[%s1933_s9 + $0x18] sm:$0xff]  ;;  %s1630_s9 = smov 96  }
 0x4f0   :  { %v1430_v42 = vpack.c.bf16 %v1083_v41, %v1082_v40  ;;  %v1001_v43 = vrot.slane %v994_v39, %v1791_v21  ;;  %v1005_v44 = vrot.slane %v994_v39, %v1797_v23  ;;  %v1631_v21 = vmov 0.0  }
 0x4f1   :  { %1015 = vmatpush1.bf16.msra.mxu0 %v968_v8 }
 0x4f2   :  { %1016 = vmatprep.subr.bf16.mxu0 %v971_v10 }
 0x4f5   :  { %1017 = vmatpush1.bf16.msra.mxu0 %v970_v12 }
 0x4f6   :  { %1018 = vmatprep.subr.bf16.mxu0 %v973_v14 }
 0x4f9   :  { %1019 = vmatpush1.bf16.msra.mxu0 %v972_v48 }
 0x4fa   :  { %1020 = vmatprep.subr.bf16.mxu0 %v975_v52 }
 0x4fd   :  { %1021 = vmatpush1.bf16.msra.mxu0 %v974_v15 }
 0x4fe   :  { %1022 = vmatprep.subr.bf16.mxu0 %v977_v9 }
 0x501   :  { %1023 = vmatpush1.bf16.msra.mxu0 %v976_v13 }
 0x502   :  { %1024 = vmatprep.subr.bf16.mxu0 %v979_v16 }
 0x505   :  { %1025 = vmatpush1.bf16.msra.mxu0 %v978_v17 }
 0x506   :  { %1026 = vmatprep.subr.bf16.mxu0 %v981_v18 }
 0x509   :  { %1027 = vmatpush1.bf16.msra.mxu0 %v980_v22 }
 0x50a   :  { %1028 = vmatprep.subr.bf16.mxu0 %v983_v24 }
 0x50d   :  { %1029 = vmatpush1.bf16.msra.mxu0 %v982_v26 }
 0x50e   :  { %1030 = vmatprep.subr.bf16.mxu0 %v985_v29 }
 0x511   :  { %1031 = vmatpush1.bf16.msra.mxu0 %v984_v59 }
 0x512   :  { %1032 = vmatprep.subr.bf16.mxu0 %v987_v63 }
 0x515   :  { %1033 = vmatpush1.bf16.msra.mxu0 %v986_v32 }
 0x516   :  { %1034 = vmatprep.subr.bf16.mxu0 %v989_v34 }
 0x519   :  { %1035 = vmatpush1.bf16.msra.mxu0 %v988_v28 }
 0x51a   :  { %1036 = vmatprep.subr.bf16.mxu0 %v991_v20 }
 0x51d   :  { %1037 = vmatpush1.bf16.msra.mxu0 %v990_v33 }
 0x51e   :  { %1038 = vmatprep.subr.bf16.mxu0 %v993_v35 }
 0x521   :  { %1039 = vmatpush1.bf16.msra.mxu0 %v992_v36 }
 0x522   :  { %1427 = vmatprep.subr.bf16.mxu0 %v1426_v31 }
 0x524   :  { %1041 = vmatmul.mubr.bf16.vlgmr.msra.gmra.mrb[16].mxu0 %v995_v37 }
 0x525   :  { %1429 = vmatpush3.bf16.msra.mxu0 %v1426_v31 }
 0x526   :  { %1431 = vmatprep.subr.bf16.mxu0 %v1430_v42 }
 0x529   :  { %1433 = vmatpush3.bf16.msra.mxu0 %v1430_v42 }
 0x52a   :  { %1416 = vmatprep.subr.mxu0 %v1631_v21 }
 0x5f7   :  { %v1042_v45 = vpop.f32.mrb[16].mxu0 }
 0x5f8   :  { %v1043_v46 = vadd.f32 %v1042_v45, %v1001_v43  ;;  %v1044_v47 = vpop.f32.mrb[17].mxu0 }
 0x5f9   :  { %v1045_v49 = vadd.f32 %v1044_v47, %v1005_v44  ;;  %v1046_v50 = vpop.f32.mrb[18].mxu0 }
 0x5fa   :  { %v1049_v51 = vmax.f32 %v1043_v46, 0.0  ;;  %v1047_v53 = vpop.f32.mrb[19].mxu0 }
 0x5fb   :  { %v1050_v7 = vmax.f32 %v1045_v49, 0.0 }
 0x5fc   :  { %1052 = vst.msk [vmem:[#allocation7] sm:$0x3] %vm1051_vm0, %v1049_v51  ;;  %1062 = vrot.lane.b32.xlu1 %v1049_v51, %s1629_s1  ;;  %1054 = vrot.lane.b32.xlu0 %v1049_v51, %s1630_s9 }
 0x5fd   :  { %1066 = vst.msk [vmem:[#allocation7 + $0x8] sm:$0x3] %vm1051_vm0, %v1050_v7 }
 0x600   :  { %1068 = vrot.lane.b32.xlu1 %v1050_v7, %s1630_s9  ;;  %1058 = vrot.lane.b32.xlu0 %v1049_v51, %s1610_s22 }
 0x604   :  { %1076 = vrot.lane.b32.xlu1 %v1050_v7, %s1629_s1  ;;  %1072 = vrot.lane.b32.xlu0 %v1050_v7, %s1610_s22  ;;  %s1633_s22 = smov [#allocation17]  }
 0x605   :  { %s1336_s15 = sshll.u32 %s1633_s22, 4  ;;  %s1337_s15 = int_to_ptr.vmem [resolvable:$true] %s1336_s15 }
 0x606   :  { %s1566_s6 = scalar_lea.vmem %s1337_s15, 256  ;;  %p1571_p5 = scmp.lt.s32.totalorder %s1337_s15, %s1337_s15 }
 0x607   :  { %p1567_p4 = scmp.ne.s32.totalorder %s1337_s15, %s1566_s6  ;;  %p1572_p6 = scmp.lt.s32.totalorder %s1566_s6, %s1566_s6 }
 0x609   :  { %p1573_p7 = por %p1572_p6, %p1571_p5 }
 0x60b   :  { %p1574_p8 = pnand %p1573_p7, %p1567_p4 }
 0x66e   :  { %v1063_v23 = vpop.permute.xlu1 %1062  ;;  %v1055_v11 = vpop.permute.xlu0 %1054 }
 0x66f   :  { %1065 = vst.msk [vmem:[#allocation7 + $0x6] sm:$0x3] %vm1051_vm0, %v1063_v23  ;;  %1057 = vst.msk [vmem:[#allocation7 + $0x2] sm:$0x3] %vm1051_vm0, %v1055_v11 }
 0x672   :  { %v1069_v54 = vpop.permute.xlu1 %1068  ;;  %v1059_v61 = vpop.permute.xlu0 %1058 }
 0x673   :  { %1071 = vst.msk [vmem:[#allocation7 + $0xa] sm:$0x3] %vm1051_vm0, %v1069_v54  ;;  %1061 = vst.msk [vmem:[#allocation7 + $0x4] sm:$0x3] %vm1051_vm0, %v1059_v61 }
 0x676   :  { %v1077_v1 = vpop.permute.xlu1 %1076  ;;  %v1073_v55 = vpop.permute.xlu0 %1072 }
 0x677   :  { %1079 = vst.msk [vmem:[#allocation7 + $0xe] sm:$0x3] %vm1051_vm0, %v1077_v1  ;;  %1075 = vst.msk [vmem:[#allocation7 + $0xc] sm:$0x3] %vm1051_vm0, %v1073_v55 }
 0x67a   :  { %v1084_v56 = vld [vmem:[#allocation7] sm:$0xff] }
 0x67b   :  { %1413 = vmatprep.mubr.msk.f32.mxu0 %vm1086_vm1, %v1084_v56 }
 0x67e   :  { %v1085_v30 = vld [vmem:[#allocation7 + $0x8] sm:$0xff] }
 0x67f   :  { %v1170_v57 = vld [vmem:[#allocation7] ss:$2 sm:$0xff]  ;;  %1414 = vmatmul.mubr.msk.f32.vlgmr.msra.gmra.mrb[20].mxu0 %vm1086_vm1, %v1085_v30  ;;  %v1249_v19 = vld [vmem:[#allocation7 + $0x1] ss:$2 sm:$0xff] }
 0x680   :  { %1417 = vmatpush3.xpose.msk.msra.mxu0 %vm1086_vm1, %v1170_v57  ;;  %1418 = vmatprep.mubr.msk.f32.mxu0 %vm1632_vm2, %v1631_v21 }
 0x681   :  { %1421 = vmatprep.subr.mxu0 %v1631_v21 }
 0x752   :  { %v1415_v58 = vpop.f32.mrb[20].mxu0 }
 0x753   :  { %1169 = vst.msk [vmem:[#allocation8 + $0x8] sm:$0xff] %vm1086_vm1, %v1415_v58  ;;  %v1159_v60 = vpop.f32.mrb[21].mxu0 }
 0x754   :  { %1168 = vst.msk [vmem:[#allocation8] sm:$0xff] %vm1086_vm1, %v1159_v60 }
 0x75b   :  { %v1171_v62 = vld [vmem:[#allocation8] ss:$2 sm:$0xff]  ;;  %v1251_v25 = vld [vmem:[#allocation8 + $0x1] ss:$2 sm:$0xff] }
 0x75c   :  { %1419 = vmatmul.mubr.msk.f32.vlgmr.msra.gmra.mrb[22].mxu0 %vm1086_vm1, %v1171_v62 }
 0x75d   :  { %1422 = vmatpush3.xpose.msk.msra.mxu0 %vm1086_vm1, %v1249_v19  ;;  %1423 = vmatprep.mubr.msk.f32.mxu0 %vm1632_vm2, %v1631_v21 }
 0x760   :  { %1424 = vmatmul.mubr.msk.f32.vlgmr.msra.gmra.mrb[24].mxu0 %vm1086_vm1, %v1251_v25 }
 0x82f   :  { %v1244_v0 = vpop.f32.mrb[22].mxu0 }
 0x830   :  { %1329 = vst.msk [vmem:[#allocation17] sm:$0xff] %vm1328_vm3, %v1244_v0  ;;  %v1420_v2 = vpop.f32.mrb[23].mxu0 }
 0x833   :  { %v1324_v3 = vpop.f32.mrb[24].mxu0 }
 0x834   :  { %1330 = vst.msk [vmem:[#allocation17 + $0x8] sm:$0xff] %vm1328_vm3, %v1324_v3  ;;  %v1425_v4 = vpop.f32.mrb[25].mxu0 }
 0x835   :  { %1577 = shalt.err (!%p1574_p8)
}
 0x836   :  { %s1578_s17 = scalar_lea.hbm %s1934_s10, 256 }
 0x837   :  { %p1579_p9 = scmp.ne.s32.totalorder %s1934_s10, %s1578_s17  ;;  %p1582_p10 = scmp.lt.u32.totalorder %s1578_s17, %s1934_s10 }
 0x839   :  { %p1584_p11 = pnand %p1582_p10, %p1579_p9 }
 0x83b   :  { %1587 = shalt.err (!%p1584_p11)
}
 0x83c   :  { %1342 = dma.vmem_to_hbm [thread:$0]  %s1337_s15, 256, %s1934_s10, [#allocation11], %s1611_s23, %s1611_s23, %s1617_s30  }
 0x83d   :  { %1602 = dma.done.wait [#allocation11], 256  }
 0x83e   :  { %1603 = vsyncadd [#allocation11], 4294967040 }
 0x83f   :  { %1346 = vsyncpa [#allocation10], 1 }
 0x840   :  { %1347 = vsyncpa [#allocation13], 1 }
 0x841   :  { %1348 = vsyncpa [#allocation16], 1 }
 0x842   :  { %1349 = vsyncpa [#allocation11], 1 }
 0x843   :  { %1350 = vsyncmov [#allocation6] }
 0x846   :  { %s1351_s3 = vpop.sfrf %1350 }
 0x847   :  { %p1391_p12 = scmp.ne.s32.totalorder %s1351_s3, 0 }
 0x849   :  { %1355 = shalt.err (%p1391_p12)  }
 0x84a   :  { %1357 = vsyncmov [#allocation6 + $0x1] }
 0x84d   :  { %s1358_s0 = vpop.sfrf %1357 }
 0x84e   :  { %p1392_p13 = scmp.ne.s32.totalorder %s1358_s0, 0 }
 0x850   :  { %1362 = shalt.err (%p1392_p13)  }
 0x851   :  { %1364 = vsyncmov [#allocation6 + $0x2] }
 0x854   :  { %s1365_s19 = vpop.sfrf %1364 }
 0x855   :  { %p1393_p0 = scmp.ne.s32.totalorder %s1365_s19, 0 }
 0x857   :  { %1369 = shalt.err (%p1393_p0)  }
 0x858   :  { %1371 = vsyncmov [#allocation6 + $0x3] }
 0x85b   :  { %s1372_s10 = vpop.sfrf %1371 }
 0x85c   :  { %p1394_p1 = scmp.ne.s32.totalorder %s1372_s10, 0 }
 0x85e   :  { %1376 = shalt.err (%p1394_p1)  }

</bundles_post_ra>
